<compile_context>
chip_gen: v5e
topology: v5e:2x2
jax: 0.10.0
libtpu: 0.0.40
codegen_flags: <defaults>
</compile_context>

<pallas_src>
import math
import jax
import jax.numpy as jnp
from jax.experimental import pallas as pl
from jax.experimental.pallas import tpu as pltpu

# ----------------------------- config ---------------------------------------
VOCAB = 64
BLOCK_SIZE = 16
N_LAYER = 2
N_HEAD = 4
N_EMBD = 32
HEAD_DIM = N_EMBD // N_HEAD
BATCH = 2
SEQ = 8


# --------------------------- in-kernel helpers -------------------------------
def _mm(a, b, trans_b=False):
    """MXU matmul: bf16 operands, f32 accumulation. trans_b contracts b's last dim."""
    dn = (((1,), (1 if trans_b else 0,)), ((), ()))
    return jax.lax.dot_general(
        a.astype(jnp.bfloat16), b.astype(jnp.bfloat16),
        dimension_numbers=dn, preferred_element_type=jnp.float32)


def _ln(x, g, b):
    mu = jnp.mean(x, axis=-1, keepdims=True)
    var = jnp.mean(jnp.square(x - mu), axis=-1, keepdims=True)
    return (x - mu) * jax.lax.rsqrt(var + 1e-5) * g + b


def _gelu(x):
    # exact GELU (erf form) -> matches nn.GELU(approximate='none')
    return 0.5 * x * (1.0 + jax.lax.erf(x * (1.0 / math.sqrt(2.0))))


# ------------------------------ fused kernel ---------------------------------
def _gpt_kernel(idx_ref, wte_ref, wpe_ref,
                ln1g_ref, ln1b_ref,
                wq_ref, wk_ref, wv_ref, bq_ref, bk_ref, bv_ref,
                projw_ref, projb_ref,
                ln2g_ref, ln2b_ref,
                fcw_ref, fcb_ref, mprojw_ref, mprojb_ref,
                lnfg_ref, lnfb_ref,
                o_ref):
    t = idx_ref.shape[1]
    vocab, c = wte_ref.shape
    n_layer = wq_ref.shape[0]
    hd = c // N_HEAD

    # ---- embeddings: exact one-hot gather for tokens (f32 MXU), static slice for pos
    idx = idx_ref[0]                                              # (t, 1) int32
    tok_oh = jnp.where(
        jax.lax.broadcasted_iota(jnp.int32, (t, vocab), 1) == idx, 1.0, 0.0)
    tok = jnp.dot(tok_oh, wte_ref[...], preferred_element_type=jnp.float32)
    pos = wpe_ref[0:t, :]                                         # sublane-aligned slice
    x = tok + pos                                                 # (t, c) f32

    row = jax.lax.broadcasted_iota(jnp.int32, (t, t), 0)
    col = jax.lax.broadcasted_iota(jnp.int32, (t, t), 1)
    causal = col <= row
    scale = 1.0 / math.sqrt(hd)

    for l in range(n_layer):
        # ---- causal self-attention sub-block ----
        h1 = _ln(x, ln1g_ref[l], ln1b_ref[l])
        q = _mm(h1, wq_ref[l]) + bq_ref[l]                        # (t, c)
        k = _mm(h1, wk_ref[l]) + bk_ref[l]
        v = _mm(h1, wv_ref[l]) + bv_ref[l]
        w_proj = projw_ref[l]                                     # (c, c)
        att = jnp.zeros((t, c), jnp.float32)
        for h in range(N_HEAD):
            sl = slice(h * hd, (h + 1) * hd)
            s = _mm(q[:, sl], k[:, sl], trans_b=True) * scale     # (t, t)
            s = jnp.where(causal, s, -1e30)                       # causal mask
            m = jnp.max(s, axis=-1, keepdims=True)
            p = jnp.exp(s - m)
            p = p * pl.reciprocal(jnp.sum(p, axis=-1, keepdims=True), approx=True)
            yh = _mm(p, v[:, sl])                                 # (t, hd)
            # fold output projection per head: y @ W == sum_h yh @ W[h-rows]
            att = att + _mm(yh, w_proj[sl, :])
        x = x + att + projb_ref[l]

        # ---- MLP sub-block ----
        h2 = _ln(x, ln2g_ref[l], ln2b_ref[l])
        m1 = _mm(h2, fcw_ref[l]) + fcb_ref[l]                     # (t, 4c)
        x = x + _mm(_gelu(m1), mprojw_ref[l]) + mprojb_ref[l]

    # ---- final LayerNorm + weight-tied lm_head (contract on wte's last dim) ----
    xf = _ln(x, lnfg_ref[...], lnfb_ref[...])
    o_ref[0] = _mm(xf, wte_ref[...], trans_b=True)                # (t, vocab)


# --------------------------- parameter init ----------------------------------
def init_params(key):
    std = 0.02
    ks = jax.random.split(key, 6)

    def normal(k, shape):
        return std * jax.random.normal(k, shape, dtype=jnp.float32)

    return {
        "wte": normal(ks[0], (VOCAB, N_EMBD)),                    # tied with lm_head
        "wpe": normal(ks[1], (BLOCK_SIZE, N_EMBD)),
        "ln1_g": jnp.ones((N_LAYER, 1, N_EMBD), jnp.float32),
        "ln1_b": jnp.zeros((N_LAYER, 1, N_EMBD), jnp.float32),
        "attn_w": normal(ks[2], (N_LAYER, N_EMBD, 3 * N_EMBD)),
        "attn_b": jnp.zeros((N_LAYER, 1, 3 * N_EMBD), jnp.float32),
        "proj_w": normal(ks[3], (N_LAYER, N_EMBD, N_EMBD)),
        "proj_b": jnp.zeros((N_LAYER, 1, N_EMBD), jnp.float32),
        "ln2_g": jnp.ones((N_LAYER, 1, N_EMBD), jnp.float32),
        "ln2_b": jnp.zeros((N_LAYER, 1, N_EMBD), jnp.float32),
        "fc_w": normal(ks[4], (N_LAYER, N_EMBD, 4 * N_EMBD)),
        "fc_b": jnp.zeros((N_LAYER, 1, 4 * N_EMBD), jnp.float32),
        "mproj_w": normal(ks[5], (N_LAYER, 4 * N_EMBD, N_EMBD)),
        "mproj_b": jnp.zeros((N_LAYER, 1, N_EMBD), jnp.float32),
        "ln_f_g": jnp.ones((1, N_EMBD), jnp.float32),
        "ln_f_b": jnp.zeros((1, N_EMBD), jnp.float32),
    }


# ------------------------------ forward --------------------------------------
def gpt_forward(params, idx):
    b, t = idx.shape
    assert t <= BLOCK_SIZE
    idx3 = idx.astype(jnp.int32).reshape(b, t, 1)
    c = N_EMBD

    # wrapper-side layout plumbing: split fused c_attn weight/bias into q/k/v
    aw, ab = params["attn_w"], params["attn_b"]
    operands = [
        params["wte"], params["wpe"],
        params["ln1_g"], params["ln1_b"],
        aw[:, :, :c], aw[:, :, c:2 * c], aw[:, :, 2 * c:],
        ab[:, :, :c], ab[:, :, c:2 * c], ab[:, :, 2 * c:],
        params["proj_w"], params["proj_b"],
        params["ln2_g"], params["ln2_b"],
        params["fc_w"], params["fc_b"],
        params["mproj_w"], params["mproj_b"],
        params["ln_f_g"], params["ln_f_b"],
    ]

    def resident(x):
        nd = x.ndim
        return pl.BlockSpec(x.shape, lambda i, _nd=nd: (0,) * _nd)   # stays in VMEM

    in_specs = [pl.BlockSpec((1, t, 1), lambda i: (i, 0, 0))]        # idx per batch
    in_specs += [resident(op) for op in operands]

    logits = pl.pallas_call(
        _gpt_kernel,
        out_shape=jax.ShapeDtypeStruct((b, t, VOCAB), jnp.float32),
        grid=(b,),
        in_specs=in_specs,
        out_specs=pl.BlockSpec((1, t, VOCAB), lambda i: (i, 0, 0)),
        compiler_params=pltpu.CompilerParams(
            dimension_semantics=("parallel",),                       # 2 TCs on v7x
            vmem_limit_bytes=32 * 1024 * 1024),
    )(idx3, *operands)
    return logits
    # TODO(synk): cross-entropy loss branch (targets is not None) not implemented;
    # the reference returns loss=None when targets=None.


# ------------------------------- main -----------------------------------------
if __name__ == "__main__":
    key = jax.random.PRNGKey(0)
    pkey, ikey = jax.random.split(key)
    params = init_params(pkey)
    idx = jax.random.randint(ikey, (BATCH, SEQ), 0, VOCAB, dtype=jnp.int32)

    logits = jax.jit(gpt_forward)(params, idx)
    jax.block_until_ready(logits)
    assert logits.shape == (BATCH, SEQ, VOCAB)
    assert bool(jnp.all(jnp.isfinite(logits)))
    print("KERNEL_OK")
</pallas_src>

<mosaic_0001>
module attributes {stable_mosaic.version = 11 : i64} {
  func.func @_gpt_kernel(%arg0: i32, %arg1: memref<1x8x1xi32, #tpu.memory_space<vmem>>, %arg2: memref<64x32xf32, #tpu.memory_space<vmem>>, %arg3: memref<16x32xf32, #tpu.memory_space<vmem>>, %arg4: memref<2x1x32xf32, #tpu.memory_space<vmem>>, %arg5: memref<2x1x32xf32, #tpu.memory_space<vmem>>, %arg6: memref<2x32x32xf32, #tpu.memory_space<vmem>>, %arg7: memref<2x32x32xf32, #tpu.memory_space<vmem>>, %arg8: memref<2x32x32xf32, #tpu.memory_space<vmem>>, %arg9: memref<2x1x32xf32, #tpu.memory_space<vmem>>, %arg10: memref<2x1x32xf32, #tpu.memory_space<vmem>>, %arg11: memref<2x1x32xf32, #tpu.memory_space<vmem>>, %arg12: memref<2x32x32xf32, #tpu.memory_space<vmem>>, %arg13: memref<2x1x32xf32, #tpu.memory_space<vmem>>, %arg14: memref<2x1x32xf32, #tpu.memory_space<vmem>>, %arg15: memref<2x1x32xf32, #tpu.memory_space<vmem>>, %arg16: memref<2x32x128xf32, #tpu.memory_space<vmem>>, %arg17: memref<2x1x128xf32, #tpu.memory_space<vmem>>, %arg18: memref<2x128x32xf32, #tpu.memory_space<vmem>>, %arg19: memref<2x1x32xf32, #tpu.memory_space<vmem>>, %arg20: memref<1x32xf32, #tpu.memory_space<vmem>>, %arg21: memref<1x32xf32, #tpu.memory_space<vmem>>, %arg22: memref<1x8x64xf32, #tpu.memory_space<vmem>>) attributes {dimension_semantics = [#tpu.dimension_semantics<parallel>], iteration_bounds = array<i64: 2>, scalar_prefetch = 0 : i64, scratch_operands = 0 : i64, tpu.core_type = #tpu.core_type<tc>, window_params = [{transform_indices = @transform_0, window_bounds = array<i64: 1, 8, 1>}, {pipeline_mode = #tpu.pipeline_mode<synchronous>, transform_indices = @transform_1, window_bounds = array<i64: 64, 32>}, {pipeline_mode = #tpu.pipeline_mode<synchronous>, transform_indices = @transform_2, window_bounds = array<i64: 16, 32>}, {pipeline_mode = #tpu.pipeline_mode<synchronous>, transform_indices = @transform_3, window_bounds = array<i64: 2, 1, 32>}, {pipeline_mode = #tpu.pipeline_mode<synchronous>, transform_indices = @transform_4, window_bounds = array<i64: 2, 1, 32>}, {pipeline_mode = #tpu.pipeline_mode<synchronous>, transform_indices = @transform_5, window_bounds = array<i64: 2, 32, 32>}, {pipeline_mode = #tpu.pipeline_mode<synchronous>, transform_indices = @transform_6, window_bounds = array<i64: 2, 32, 32>}, {pipeline_mode = #tpu.pipeline_mode<synchronous>, transform_indices = @transform_7, window_bounds = array<i64: 2, 32, 32>}, {pipeline_mode = #tpu.pipeline_mode<synchronous>, transform_indices = @transform_8, window_bounds = array<i64: 2, 1, 32>}, {pipeline_mode = #tpu.pipeline_mode<synchronous>, transform_indices = @transform_9, window_bounds = array<i64: 2, 1, 32>}, {pipeline_mode = #tpu.pipeline_mode<synchronous>, transform_indices = @transform_10, window_bounds = array<i64: 2, 1, 32>}, {pipeline_mode = #tpu.pipeline_mode<synchronous>, transform_indices = @transform_11, window_bounds = array<i64: 2, 32, 32>}, {pipeline_mode = #tpu.pipeline_mode<synchronous>, transform_indices = @transform_12, window_bounds = array<i64: 2, 1, 32>}, {pipeline_mode = #tpu.pipeline_mode<synchronous>, transform_indices = @transform_13, window_bounds = array<i64: 2, 1, 32>}, {pipeline_mode = #tpu.pipeline_mode<synchronous>, transform_indices = @transform_14, window_bounds = array<i64: 2, 1, 32>}, {pipeline_mode = #tpu.pipeline_mode<synchronous>, transform_indices = @transform_15, window_bounds = array<i64: 2, 32, 128>}, {pipeline_mode = #tpu.pipeline_mode<synchronous>, transform_indices = @transform_16, window_bounds = array<i64: 2, 1, 128>}, {pipeline_mode = #tpu.pipeline_mode<synchronous>, transform_indices = @transform_17, window_bounds = array<i64: 2, 128, 32>}, {pipeline_mode = #tpu.pipeline_mode<synchronous>, transform_indices = @transform_18, window_bounds = array<i64: 2, 1, 32>}, {pipeline_mode = #tpu.pipeline_mode<synchronous>, transform_indices = @transform_19, window_bounds = array<i64: 1, 32>}, {pipeline_mode = #tpu.pipeline_mode<synchronous>, transform_indices = @transform_20, window_bounds = array<i64: 1, 32>}, {transform_indices = @transform_21, window_bounds = array<i64: 1, 8, 64>}]} {
    %c0 = arith.constant 0 : index
    %c0_0 = arith.constant 0 : index
    %c0_1 = arith.constant 0 : index
    %0 = vector.load %arg1[%c0, %c0_0, %c0_1] : memref<1x8x1xi32, #tpu.memory_space<vmem>>, vector<1x8x1xi32>
    %1 = vector.shape_cast %0 : vector<1x8x1xi32> to vector<8x1xi32>
    %2 = tpu.iota {dimensions = array<i32: 1>} : vector<8x64xi32>
    %3 = vector.broadcast %1 : vector<8x1xi32> to vector<8x64xi32>
    %4 = arith.cmpi eq, %2, %3 : vector<8x64xi32>
    %cst = arith.constant 1.000000e+00 : f32
    %cst_2 = arith.constant 0.000000e+00 : f32
    %5 = vector.broadcast %cst : f32 to vector<8x64xf32>
    %6 = vector.broadcast %cst_2 : f32 to vector<8x64xf32>
    %7 = arith.select %4, %5, %6 : vector<8x64xi1>, vector<8x64xf32>
    %c0_3 = arith.constant 0 : index
    %c0_4 = arith.constant 0 : index
    %8 = vector.load %arg2[%c0_3, %c0_4] : memref<64x32xf32, #tpu.memory_space<vmem>>, vector<64x32xf32>
    %cst_5 = arith.constant dense<0.000000e+00> : vector<8x32xf32>
    %9 = tpu.matmul %7, %8, %cst_5 {dimension_numbers = #tpu.dot_dimension_numbers<[1], [0], [0], [1], [0, 0, 1, 1], [], []>} : vector<8x64xf32>, vector<64x32xf32>, vector<8x32xf32> -> vector<8x32xf32>
    %c0_6 = arith.constant 0 : index
    %c0_7 = arith.constant 0 : index
    %10 = vector.load %arg3[%c0_6, %c0_7] : memref<16x32xf32, #tpu.memory_space<vmem>>, vector<8x32xf32>
    %11 = arith.addf %9, %10 : vector<8x32xf32>
    %12 = tpu.iota {dimensions = array<i32: 0>} : vector<8x8xi32>
    %13 = tpu.iota {dimensions = array<i32: 1>} : vector<8x8xi32>
    %14 = arith.cmpi sle, %13, %12 : vector<8x8xi32>
    %c0_8 = arith.constant 0 : index
    %c0_9 = arith.constant 0 : index
    %c0_10 = arith.constant 0 : index
    %15 = vector.load %arg4[%c0_8, %c0_9, %c0_10] : memref<2x1x32xf32, #tpu.memory_space<vmem>>, vector<1x1x32xf32>
    %16 = vector.shape_cast %15 : vector<1x1x32xf32> to vector<1x32xf32>
    %c0_11 = arith.constant 0 : index
    %c0_12 = arith.constant 0 : index
    %c0_13 = arith.constant 0 : index
    %17 = vector.load %arg5[%c0_11, %c0_12, %c0_13] : memref<2x1x32xf32, #tpu.memory_space<vmem>>, vector<1x1x32xf32>
    %18 = vector.shape_cast %17 : vector<1x1x32xf32> to vector<1x32xf32>
    %cst_14 = arith.constant dense<0.000000e+00> : vector<8xf32>
    %19 = vector.multi_reduction <add>, %11, %cst_14 [1] : vector<8x32xf32> to vector<8xf32>
    %20 = vector.shape_cast %19 : vector<8xf32> to vector<8x1xf32>
    %cst_15 = arith.constant 3.200000e+01 : f32
    %21 = vector.broadcast %cst_15 : f32 to vector<8x1xf32>
    %22 = arith.divf %20, %21 : vector<8x1xf32>
    %23 = vector.broadcast %22 : vector<8x1xf32> to vector<8x32xf32>
    %24 = arith.subf %11, %23 : vector<8x32xf32>
    %25 = arith.mulf %24, %24 : vector<8x32xf32>
    %cst_16 = arith.constant dense<0.000000e+00> : vector<8xf32>
    %26 = vector.multi_reduction <add>, %25, %cst_16 [1] : vector<8x32xf32> to vector<8xf32>
    %27 = vector.shape_cast %26 : vector<8xf32> to vector<8x1xf32>
    %cst_17 = arith.constant 3.200000e+01 : f32
    %28 = vector.broadcast %cst_17 : f32 to vector<8x1xf32>
    %29 = arith.divf %27, %28 : vector<8x1xf32>
    %30 = vector.broadcast %22 : vector<8x1xf32> to vector<8x32xf32>
    %31 = arith.subf %11, %30 : vector<8x32xf32>
    %cst_18 = arith.constant 9.99999974E-6 : f32
    %32 = vector.broadcast %cst_18 : f32 to vector<8x1xf32>
    %33 = arith.addf %29, %32 : vector<8x1xf32>
    %34 = math.rsqrt %33 : vector<8x1xf32>
    %35 = vector.broadcast %34 : vector<8x1xf32> to vector<8x32xf32>
    %36 = arith.mulf %31, %35 : vector<8x32xf32>
    %37 = vector.broadcast %16 : vector<1x32xf32> to vector<8x32xf32>
    %38 = arith.mulf %36, %37 : vector<8x32xf32>
    %39 = vector.broadcast %18 : vector<1x32xf32> to vector<8x32xf32>
    %40 = arith.addf %38, %39 : vector<8x32xf32>
    %c0_19 = arith.constant 0 : index
    %c0_20 = arith.constant 0 : index
    %c0_21 = arith.constant 0 : index
    %41 = vector.load %arg6[%c0_19, %c0_20, %c0_21] : memref<2x32x32xf32, #tpu.memory_space<vmem>>, vector<1x32x32xf32>
    %42 = vector.shape_cast %41 : vector<1x32x32xf32> to vector<32x32xf32>
    %43 = arith.truncf %40 : vector<8x32xf32> to vector<8x32xbf16>
    %44 = arith.truncf %42 : vector<32x32xf32> to vector<32x32xbf16>
    %cst_22 = arith.constant dense<0.000000e+00> : vector<8x32xf32>
    %45 = tpu.matmul %43, %44, %cst_22 {dimension_numbers = #tpu.dot_dimension_numbers<[1], [0], [0], [1], [0, 0, 1, 1], [], []>} : vector<8x32xbf16>, vector<32x32xbf16>, vector<8x32xf32> -> vector<8x32xf32>
    %c0_23 = arith.constant 0 : index
    %c0_24 = arith.constant 0 : index
    %c0_25 = arith.constant 0 : index
    %46 = vector.load %arg9[%c0_23, %c0_24, %c0_25] : memref<2x1x32xf32, #tpu.memory_space<vmem>>, vector<1x1x32xf32>
    %47 = vector.shape_cast %46 : vector<1x1x32xf32> to vector<1x32xf32>
    %48 = vector.broadcast %47 : vector<1x32xf32> to vector<8x32xf32>
    %49 = arith.addf %45, %48 : vector<8x32xf32>
    %c0_26 = arith.constant 0 : index
    %c0_27 = arith.constant 0 : index
    %c0_28 = arith.constant 0 : index
    %50 = vector.load %arg7[%c0_26, %c0_27, %c0_28] : memref<2x32x32xf32, #tpu.memory_space<vmem>>, vector<1x32x32xf32>
    %51 = vector.shape_cast %50 : vector<1x32x32xf32> to vector<32x32xf32>
    %52 = arith.truncf %40 : vector<8x32xf32> to vector<8x32xbf16>
    %53 = arith.truncf %51 : vector<32x32xf32> to vector<32x32xbf16>
    %cst_29 = arith.constant dense<0.000000e+00> : vector<8x32xf32>
    %54 = tpu.matmul %52, %53, %cst_29 {dimension_numbers = #tpu.dot_dimension_numbers<[1], [0], [0], [1], [0, 0, 1, 1], [], []>} : vector<8x32xbf16>, vector<32x32xbf16>, vector<8x32xf32> -> vector<8x32xf32>
    %c0_30 = arith.constant 0 : index
    %c0_31 = arith.constant 0 : index
    %c0_32 = arith.constant 0 : index
    %55 = vector.load %arg10[%c0_30, %c0_31, %c0_32] : memref<2x1x32xf32, #tpu.memory_space<vmem>>, vector<1x1x32xf32>
    %56 = vector.shape_cast %55 : vector<1x1x32xf32> to vector<1x32xf32>
    %57 = vector.broadcast %56 : vector<1x32xf32> to vector<8x32xf32>
    %58 = arith.addf %54, %57 : vector<8x32xf32>
    %c0_33 = arith.constant 0 : index
    %c0_34 = arith.constant 0 : index
    %c0_35 = arith.constant 0 : index
    %59 = vector.load %arg8[%c0_33, %c0_34, %c0_35] : memref<2x32x32xf32, #tpu.memory_space<vmem>>, vector<1x32x32xf32>
    %60 = vector.shape_cast %59 : vector<1x32x32xf32> to vector<32x32xf32>
    %61 = arith.truncf %40 : vector<8x32xf32> to vector<8x32xbf16>
    %62 = arith.truncf %60 : vector<32x32xf32> to vector<32x32xbf16>
    %cst_36 = arith.constant dense<0.000000e+00> : vector<8x32xf32>
    %63 = tpu.matmul %61, %62, %cst_36 {dimension_numbers = #tpu.dot_dimension_numbers<[1], [0], [0], [1], [0, 0, 1, 1], [], []>} : vector<8x32xbf16>, vector<32x32xbf16>, vector<8x32xf32> -> vector<8x32xf32>
    %c0_37 = arith.constant 0 : index
    %c0_38 = arith.constant 0 : index
    %c0_39 = arith.constant 0 : index
    %64 = vector.load %arg11[%c0_37, %c0_38, %c0_39] : memref<2x1x32xf32, #tpu.memory_space<vmem>>, vector<1x1x32xf32>
    %65 = vector.shape_cast %64 : vector<1x1x32xf32> to vector<1x32xf32>
    %66 = vector.broadcast %65 : vector<1x32xf32> to vector<8x32xf32>
    %67 = arith.addf %63, %66 : vector<8x32xf32>
    %c0_40 = arith.constant 0 : index
    %c0_41 = arith.constant 0 : index
    %c0_42 = arith.constant 0 : index
    %68 = vector.load %arg12[%c0_40, %c0_41, %c0_42] : memref<2x32x32xf32, #tpu.memory_space<vmem>>, vector<1x32x32xf32>
    %69 = vector.shape_cast %68 : vector<1x32x32xf32> to vector<32x32xf32>
    %cst_43 = arith.constant 0.000000e+00 : f32
    %70 = vector.broadcast %cst_43 : f32 to vector<8x32xf32>
    %71 = vector.extract_strided_slice %49 {offsets = [0, 0], sizes = [8, 8], strides = [1, 1]} : vector<8x32xf32> to vector<8x8xf32>
    %72 = vector.extract_strided_slice %58 {offsets = [0, 0], sizes = [8, 8], strides = [1, 1]} : vector<8x32xf32> to vector<8x8xf32>
    %73 = arith.truncf %71 : vector<8x8xf32> to vector<8x8xbf16>
    %74 = arith.truncf %72 : vector<8x8xf32> to vector<8x8xbf16>
    %cst_44 = arith.constant dense<0.000000e+00> : vector<8x8xf32>
    %75 = tpu.matmul %73, %74, %cst_44 {dimension_numbers = #tpu.dot_dimension_numbers<[1], [1], [0], [0], [0, 0, 1, 0], [], []>} : vector<8x8xbf16>, vector<8x8xbf16>, vector<8x8xf32> -> vector<8x8xf32>
    %cst_45 = arith.constant 0.353553385 : f32
    %76 = vector.broadcast %cst_45 : f32 to vector<8x8xf32>
    %77 = arith.mulf %75, %76 : vector<8x8xf32>
    %cst_46 = arith.constant -1.000000e+30 : f32
    %78 = vector.broadcast %cst_46 : f32 to vector<8x8xf32>
    %79 = arith.select %14, %77, %78 : vector<8x8xi1>, vector<8x8xf32>
    %cst_47 = arith.constant dense<0xFF800000> : vector<8xf32>
    %80 = vector.multi_reduction <maximumf>, %79, %cst_47 [1] : vector<8x8xf32> to vector<8xf32>
    %81 = vector.shape_cast %80 : vector<8xf32> to vector<8x1xf32>
    %82 = vector.broadcast %81 : vector<8x1xf32> to vector<8x8xf32>
    %83 = arith.subf %79, %82 : vector<8x8xf32>
    %84 = math.exp %83 : vector<8x8xf32>
    %cst_48 = arith.constant dense<0.000000e+00> : vector<8xf32>
    %85 = vector.multi_reduction <add>, %84, %cst_48 [1] : vector<8x8xf32> to vector<8xf32>
    %86 = vector.shape_cast %85 : vector<8xf32> to vector<8x1xf32>
    %87 = tpu.reciprocal %86 {approx = true} : vector<8x1xf32> -> vector<8x1xf32>
    %88 = vector.broadcast %87 : vector<8x1xf32> to vector<8x8xf32>
    %89 = arith.mulf %84, %88 : vector<8x8xf32>
    %90 = vector.extract_strided_slice %67 {offsets = [0, 0], sizes = [8, 8], strides = [1, 1]} : vector<8x32xf32> to vector<8x8xf32>
    %91 = arith.truncf %89 : vector<8x8xf32> to vector<8x8xbf16>
    %92 = arith.truncf %90 : vector<8x8xf32> to vector<8x8xbf16>
    %cst_49 = arith.constant dense<0.000000e+00> : vector<8x8xf32>
    %93 = tpu.matmul %91, %92, %cst_49 {dimension_numbers = #tpu.dot_dimension_numbers<[1], [0], [0], [1], [0, 0, 1, 1], [], []>} : vector<8x8xbf16>, vector<8x8xbf16>, vector<8x8xf32> -> vector<8x8xf32>
    %94 = vector.extract_strided_slice %69 {offsets = [0, 0], sizes = [8, 32], strides = [1, 1]} : vector<32x32xf32> to vector<8x32xf32>
    %95 = arith.truncf %93 : vector<8x8xf32> to vector<8x8xbf16>
    %96 = arith.truncf %94 : vector<8x32xf32> to vector<8x32xbf16>
    %cst_50 = arith.constant dense<0.000000e+00> : vector<8x32xf32>
    %97 = tpu.matmul %95, %96, %cst_50 {dimension_numbers = #tpu.dot_dimension_numbers<[1], [0], [0], [1], [0, 0, 1, 1], [], []>} : vector<8x8xbf16>, vector<8x32xbf16>, vector<8x32xf32> -> vector<8x32xf32>
    %98 = arith.addf %70, %97 : vector<8x32xf32>
    %99 = vector.extract_strided_slice %49 {offsets = [0, 8], sizes = [8, 8], strides = [1, 1]} : vector<8x32xf32> to vector<8x8xf32>
    %100 = vector.extract_strided_slice %58 {offsets = [0, 8], sizes = [8, 8], strides = [1, 1]} : vector<8x32xf32> to vector<8x8xf32>
    %101 = arith.truncf %99 : vector<8x8xf32> to vector<8x8xbf16>
    %102 = arith.truncf %100 : vector<8x8xf32> to vector<8x8xbf16>
    %cst_51 = arith.constant dense<0.000000e+00> : vector<8x8xf32>
    %103 = tpu.matmul %101, %102, %cst_51 {dimension_numbers = #tpu.dot_dimension_numbers<[1], [1], [0], [0], [0, 0, 1, 0], [], []>} : vector<8x8xbf16>, vector<8x8xbf16>, vector<8x8xf32> -> vector<8x8xf32>
    %cst_52 = arith.constant 0.353553385 : f32
    %104 = vector.broadcast %cst_52 : f32 to vector<8x8xf32>
    %105 = arith.mulf %103, %104 : vector<8x8xf32>
    %cst_53 = arith.constant -1.000000e+30 : f32
    %106 = vector.broadcast %cst_53 : f32 to vector<8x8xf32>
    %107 = arith.select %14, %105, %106 : vector<8x8xi1>, vector<8x8xf32>
    %cst_54 = arith.constant dense<0xFF800000> : vector<8xf32>
    %108 = vector.multi_reduction <maximumf>, %107, %cst_54 [1] : vector<8x8xf32> to vector<8xf32>
    %109 = vector.shape_cast %108 : vector<8xf32> to vector<8x1xf32>
    %110 = vector.broadcast %109 : vector<8x1xf32> to vector<8x8xf32>
    %111 = arith.subf %107, %110 : vector<8x8xf32>
    %112 = math.exp %111 : vector<8x8xf32>
    %cst_55 = arith.constant dense<0.000000e+00> : vector<8xf32>
    %113 = vector.multi_reduction <add>, %112, %cst_55 [1] : vector<8x8xf32> to vector<8xf32>
    %114 = vector.shape_cast %113 : vector<8xf32> to vector<8x1xf32>
    %115 = tpu.reciprocal %114 {approx = true} : vector<8x1xf32> -> vector<8x1xf32>
    %116 = vector.broadcast %115 : vector<8x1xf32> to vector<8x8xf32>
    %117 = arith.mulf %112, %116 : vector<8x8xf32>
    %118 = vector.extract_strided_slice %67 {offsets = [0, 8], sizes = [8, 8], strides = [1, 1]} : vector<8x32xf32> to vector<8x8xf32>
    %119 = arith.truncf %117 : vector<8x8xf32> to vector<8x8xbf16>
    %120 = arith.truncf %118 : vector<8x8xf32> to vector<8x8xbf16>
    %cst_56 = arith.constant dense<0.000000e+00> : vector<8x8xf32>
    %121 = tpu.matmul %119, %120, %cst_56 {dimension_numbers = #tpu.dot_dimension_numbers<[1], [0], [0], [1], [0, 0, 1, 1], [], []>} : vector<8x8xbf16>, vector<8x8xbf16>, vector<8x8xf32> -> vector<8x8xf32>
    %122 = vector.extract_strided_slice %69 {offsets = [8, 0], sizes = [8, 32], strides = [1, 1]} : vector<32x32xf32> to vector<8x32xf32>
    %123 = arith.truncf %121 : vector<8x8xf32> to vector<8x8xbf16>
    %124 = arith.truncf %122 : vector<8x32xf32> to vector<8x32xbf16>
    %cst_57 = arith.constant dense<0.000000e+00> : vector<8x32xf32>
    %125 = tpu.matmul %123, %124, %cst_57 {dimension_numbers = #tpu.dot_dimension_numbers<[1], [0], [0], [1], [0, 0, 1, 1], [], []>} : vector<8x8xbf16>, vector<8x32xbf16>, vector<8x32xf32> -> vector<8x32xf32>
    %126 = arith.addf %98, %125 : vector<8x32xf32>
    %127 = vector.extract_strided_slice %49 {offsets = [0, 16], sizes = [8, 8], strides = [1, 1]} : vector<8x32xf32> to vector<8x8xf32>
    %128 = vector.extract_strided_slice %58 {offsets = [0, 16], sizes = [8, 8], strides = [1, 1]} : vector<8x32xf32> to vector<8x8xf32>
    %129 = arith.truncf %127 : vector<8x8xf32> to vector<8x8xbf16>
    %130 = arith.truncf %128 : vector<8x8xf32> to vector<8x8xbf16>
    %cst_58 = arith.constant dense<0.000000e+00> : vector<8x8xf32>
    %131 = tpu.matmul %129, %130, %cst_58 {dimension_numbers = #tpu.dot_dimension_numbers<[1], [1], [0], [0], [0, 0, 1, 0], [], []>} : vector<8x8xbf16>, vector<8x8xbf16>, vector<8x8xf32> -> vector<8x8xf32>
    %cst_59 = arith.constant 0.353553385 : f32
    %132 = vector.broadcast %cst_59 : f32 to vector<8x8xf32>
    %133 = arith.mulf %131, %132 : vector<8x8xf32>
    %cst_60 = arith.constant -1.000000e+30 : f32
    %134 = vector.broadcast %cst_60 : f32 to vector<8x8xf32>
    %135 = arith.select %14, %133, %134 : vector<8x8xi1>, vector<8x8xf32>
    %cst_61 = arith.constant dense<0xFF800000> : vector<8xf32>
    %136 = vector.multi_reduction <maximumf>, %135, %cst_61 [1] : vector<8x8xf32> to vector<8xf32>
    %137 = vector.shape_cast %136 : vector<8xf32> to vector<8x1xf32>
    %138 = vector.broadcast %137 : vector<8x1xf32> to vector<8x8xf32>
    %139 = arith.subf %135, %138 : vector<8x8xf32>
    %140 = math.exp %139 : vector<8x8xf32>
    %cst_62 = arith.constant dense<0.000000e+00> : vector<8xf32>
    %141 = vector.multi_reduction <add>, %140, %cst_62 [1] : vector<8x8xf32> to vector<8xf32>
    %142 = vector.shape_cast %141 : vector<8xf32> to vector<8x1xf32>
    %143 = tpu.reciprocal %142 {approx = true} : vector<8x1xf32> -> vector<8x1xf32>
    %144 = vector.broadcast %143 : vector<8x1xf32> to vector<8x8xf32>
    %145 = arith.mulf %140, %144 : vector<8x8xf32>
    %146 = vector.extract_strided_slice %67 {offsets = [0, 16], sizes = [8, 8], strides = [1, 1]} : vector<8x32xf32> to vector<8x8xf32>
    %147 = arith.truncf %145 : vector<8x8xf32> to vector<8x8xbf16>
    %148 = arith.truncf %146 : vector<8x8xf32> to vector<8x8xbf16>
    %cst_63 = arith.constant dense<0.000000e+00> : vector<8x8xf32>
    %149 = tpu.matmul %147, %148, %cst_63 {dimension_numbers = #tpu.dot_dimension_numbers<[1], [0], [0], [1], [0, 0, 1, 1], [], []>} : vector<8x8xbf16>, vector<8x8xbf16>, vector<8x8xf32> -> vector<8x8xf32>
    %150 = vector.extract_strided_slice %69 {offsets = [16, 0], sizes = [8, 32], strides = [1, 1]} : vector<32x32xf32> to vector<8x32xf32>
    %151 = arith.truncf %149 : vector<8x8xf32> to vector<8x8xbf16>
    %152 = arith.truncf %150 : vector<8x32xf32> to vector<8x32xbf16>
    %cst_64 = arith.constant dense<0.000000e+00> : vector<8x32xf32>
    %153 = tpu.matmul %151, %152, %cst_64 {dimension_numbers = #tpu.dot_dimension_numbers<[1], [0], [0], [1], [0, 0, 1, 1], [], []>} : vector<8x8xbf16>, vector<8x32xbf16>, vector<8x32xf32> -> vector<8x32xf32>
    %154 = arith.addf %126, %153 : vector<8x32xf32>
    %155 = vector.extract_strided_slice %49 {offsets = [0, 24], sizes = [8, 8], strides = [1, 1]} : vector<8x32xf32> to vector<8x8xf32>
    %156 = vector.extract_strided_slice %58 {offsets = [0, 24], sizes = [8, 8], strides = [1, 1]} : vector<8x32xf32> to vector<8x8xf32>
    %157 = arith.truncf %155 : vector<8x8xf32> to vector<8x8xbf16>
    %158 = arith.truncf %156 : vector<8x8xf32> to vector<8x8xbf16>
    %cst_65 = arith.constant dense<0.000000e+00> : vector<8x8xf32>
    %159 = tpu.matmul %157, %158, %cst_65 {dimension_numbers = #tpu.dot_dimension_numbers<[1], [1], [0], [0], [0, 0, 1, 0], [], []>} : vector<8x8xbf16>, vector<8x8xbf16>, vector<8x8xf32> -> vector<8x8xf32>
    %cst_66 = arith.constant 0.353553385 : f32
    %160 = vector.broadcast %cst_66 : f32 to vector<8x8xf32>
    %161 = arith.mulf %159, %160 : vector<8x8xf32>
    %cst_67 = arith.constant -1.000000e+30 : f32
    %162 = vector.broadcast %cst_67 : f32 to vector<8x8xf32>
    %163 = arith.select %14, %161, %162 : vector<8x8xi1>, vector<8x8xf32>
    %cst_68 = arith.constant dense<0xFF800000> : vector<8xf32>
    %164 = vector.multi_reduction <maximumf>, %163, %cst_68 [1] : vector<8x8xf32> to vector<8xf32>
    %165 = vector.shape_cast %164 : vector<8xf32> to vector<8x1xf32>
    %166 = vector.broadcast %165 : vector<8x1xf32> to vector<8x8xf32>
    %167 = arith.subf %163, %166 : vector<8x8xf32>
    %168 = math.exp %167 : vector<8x8xf32>
    %cst_69 = arith.constant dense<0.000000e+00> : vector<8xf32>
    %169 = vector.multi_reduction <add>, %168, %cst_69 [1] : vector<8x8xf32> to vector<8xf32>
    %170 = vector.shape_cast %169 : vector<8xf32> to vector<8x1xf32>
    %171 = tpu.reciprocal %170 {approx = true} : vector<8x1xf32> -> vector<8x1xf32>
    %172 = vector.broadcast %171 : vector<8x1xf32> to vector<8x8xf32>
    %173 = arith.mulf %168, %172 : vector<8x8xf32>
    %174 = vector.extract_strided_slice %67 {offsets = [0, 24], sizes = [8, 8], strides = [1, 1]} : vector<8x32xf32> to vector<8x8xf32>
    %175 = arith.truncf %173 : vector<8x8xf32> to vector<8x8xbf16>
    %176 = arith.truncf %174 : vector<8x8xf32> to vector<8x8xbf16>
    %cst_70 = arith.constant dense<0.000000e+00> : vector<8x8xf32>
    %177 = tpu.matmul %175, %176, %cst_70 {dimension_numbers = #tpu.dot_dimension_numbers<[1], [0], [0], [1], [0, 0, 1, 1], [], []>} : vector<8x8xbf16>, vector<8x8xbf16>, vector<8x8xf32> -> vector<8x8xf32>
    %178 = vector.extract_strided_slice %69 {offsets = [24, 0], sizes = [8, 32], strides = [1, 1]} : vector<32x32xf32> to vector<8x32xf32>
    %179 = arith.truncf %177 : vector<8x8xf32> to vector<8x8xbf16>
    %180 = arith.truncf %178 : vector<8x32xf32> to vector<8x32xbf16>
    %cst_71 = arith.constant dense<0.000000e+00> : vector<8x32xf32>
    %181 = tpu.matmul %179, %180, %cst_71 {dimension_numbers = #tpu.dot_dimension_numbers<[1], [0], [0], [1], [0, 0, 1, 1], [], []>} : vector<8x8xbf16>, vector<8x32xbf16>, vector<8x32xf32> -> vector<8x32xf32>
    %182 = arith.addf %154, %181 : vector<8x32xf32>
    %183 = arith.addf %11, %182 : vector<8x32xf32>
    %c0_72 = arith.constant 0 : index
    %c0_73 = arith.constant 0 : index
    %c0_74 = arith.constant 0 : index
    %184 = vector.load %arg13[%c0_72, %c0_73, %c0_74] : memref<2x1x32xf32, #tpu.memory_space<vmem>>, vector<1x1x32xf32>
    %185 = vector.shape_cast %184 : vector<1x1x32xf32> to vector<1x32xf32>
    %186 = vector.broadcast %185 : vector<1x32xf32> to vector<8x32xf32>
    %187 = arith.addf %183, %186 : vector<8x32xf32>
    %c0_75 = arith.constant 0 : index
    %c0_76 = arith.constant 0 : index
    %c0_77 = arith.constant 0 : index
    %188 = vector.load %arg14[%c0_75, %c0_76, %c0_77] : memref<2x1x32xf32, #tpu.memory_space<vmem>>, vector<1x1x32xf32>
    %189 = vector.shape_cast %188 : vector<1x1x32xf32> to vector<1x32xf32>
    %c0_78 = arith.constant 0 : index
    %c0_79 = arith.constant 0 : index
    %c0_80 = arith.constant 0 : index
    %190 = vector.load %arg15[%c0_78, %c0_79, %c0_80] : memref<2x1x32xf32, #tpu.memory_space<vmem>>, vector<1x1x32xf32>
    %191 = vector.shape_cast %190 : vector<1x1x32xf32> to vector<1x32xf32>
    %cst_81 = arith.constant dense<0.000000e+00> : vector<8xf32>
    %192 = vector.multi_reduction <add>, %187, %cst_81 [1] : vector<8x32xf32> to vector<8xf32>
    %193 = vector.shape_cast %192 : vector<8xf32> to vector<8x1xf32>
    %cst_82 = arith.constant 3.200000e+01 : f32
    %194 = vector.broadcast %cst_82 : f32 to vector<8x1xf32>
    %195 = arith.divf %193, %194 : vector<8x1xf32>
    %196 = vector.broadcast %195 : vector<8x1xf32> to vector<8x32xf32>
    %197 = arith.subf %187, %196 : vector<8x32xf32>
    %198 = arith.mulf %197, %197 : vector<8x32xf32>
    %cst_83 = arith.constant dense<0.000000e+00> : vector<8xf32>
    %199 = vector.multi_reduction <add>, %198, %cst_83 [1] : vector<8x32xf32> to vector<8xf32>
    %200 = vector.shape_cast %199 : vector<8xf32> to vector<8x1xf32>
    %cst_84 = arith.constant 3.200000e+01 : f32
    %201 = vector.broadcast %cst_84 : f32 to vector<8x1xf32>
    %202 = arith.divf %200, %201 : vector<8x1xf32>
    %203 = vector.broadcast %195 : vector<8x1xf32> to vector<8x32xf32>
    %204 = arith.subf %187, %203 : vector<8x32xf32>
    %cst_85 = arith.constant 9.99999974E-6 : f32
    %205 = vector.broadcast %cst_85 : f32 to vector<8x1xf32>
    %206 = arith.addf %202, %205 : vector<8x1xf32>
    %207 = math.rsqrt %206 : vector<8x1xf32>
    %208 = vector.broadcast %207 : vector<8x1xf32> to vector<8x32xf32>
    %209 = arith.mulf %204, %208 : vector<8x32xf32>
    %210 = vector.broadcast %189 : vector<1x32xf32> to vector<8x32xf32>
    %211 = arith.mulf %209, %210 : vector<8x32xf32>
    %212 = vector.broadcast %191 : vector<1x32xf32> to vector<8x32xf32>
    %213 = arith.addf %211, %212 : vector<8x32xf32>
    %c0_86 = arith.constant 0 : index
    %c0_87 = arith.constant 0 : index
    %c0_88 = arith.constant 0 : index
    %214 = vector.load %arg16[%c0_86, %c0_87, %c0_88] : memref<2x32x128xf32, #tpu.memory_space<vmem>>, vector<1x32x128xf32>
    %215 = vector.shape_cast %214 : vector<1x32x128xf32> to vector<32x128xf32>
    %216 = arith.truncf %213 : vector<8x32xf32> to vector<8x32xbf16>
    %217 = arith.truncf %215 : vector<32x128xf32> to vector<32x128xbf16>
    %cst_89 = arith.constant dense<0.000000e+00> : vector<8x128xf32>
    %218 = tpu.matmul %216, %217, %cst_89 {dimension_numbers = #tpu.dot_dimension_numbers<[1], [0], [0], [1], [0, 0, 1, 1], [], []>} : vector<8x32xbf16>, vector<32x128xbf16>, vector<8x128xf32> -> vector<8x128xf32>
    %c0_90 = arith.constant 0 : index
    %c0_91 = arith.constant 0 : index
    %c0_92 = arith.constant 0 : index
    %219 = vector.load %arg17[%c0_90, %c0_91, %c0_92] : memref<2x1x128xf32, #tpu.memory_space<vmem>>, vector<1x1x128xf32>
    %220 = vector.shape_cast %219 : vector<1x1x128xf32> to vector<1x128xf32>
    %221 = vector.broadcast %220 : vector<1x128xf32> to vector<8x128xf32>
    %222 = arith.addf %218, %221 : vector<8x128xf32>
    %cst_93 = arith.constant 5.000000e-01 : f32
    %223 = vector.broadcast %cst_93 : f32 to vector<8x128xf32>
    %224 = arith.mulf %223, %222 : vector<8x128xf32>
    %cst_94 = arith.constant 0.707106769 : f32
    %225 = vector.broadcast %cst_94 : f32 to vector<8x128xf32>
    %226 = arith.mulf %222, %225 : vector<8x128xf32>
    %227 = math.erf %226 : vector<8x128xf32>
    %cst_95 = arith.constant 1.000000e+00 : f32
    %228 = vector.broadcast %cst_95 : f32 to vector<8x128xf32>
    %229 = arith.addf %228, %227 : vector<8x128xf32>
    %230 = arith.mulf %224, %229 : vector<8x128xf32>
    %c0_96 = arith.constant 0 : index
    %c0_97 = arith.constant 0 : index
    %c0_98 = arith.constant 0 : index
    %231 = vector.load %arg18[%c0_96, %c0_97, %c0_98] : memref<2x128x32xf32, #tpu.memory_space<vmem>>, vector<1x128x32xf32>
    %232 = vector.shape_cast %231 : vector<1x128x32xf32> to vector<128x32xf32>
    %233 = arith.truncf %230 : vector<8x128xf32> to vector<8x128xbf16>
    %234 = arith.truncf %232 : vector<128x32xf32> to vector<128x32xbf16>
    %cst_99 = arith.constant dense<0.000000e+00> : vector<8x32xf32>
    %235 = tpu.matmul %233, %234, %cst_99 {dimension_numbers = #tpu.dot_dimension_numbers<[1], [0], [0], [1], [0, 0, 1, 1], [], []>} : vector<8x128xbf16>, vector<128x32xbf16>, vector<8x32xf32> -> vector<8x32xf32>
    %236 = arith.addf %187, %235 : vector<8x32xf32>
    %c0_100 = arith.constant 0 : index
    %c0_101 = arith.constant 0 : index
    %c0_102 = arith.constant 0 : index
    %237 = vector.load %arg19[%c0_100, %c0_101, %c0_102] : memref<2x1x32xf32, #tpu.memory_space<vmem>>, vector<1x1x32xf32>
    %238 = vector.shape_cast %237 : vector<1x1x32xf32> to vector<1x32xf32>
    %239 = vector.broadcast %238 : vector<1x32xf32> to vector<8x32xf32>
    %240 = arith.addf %236, %239 : vector<8x32xf32>
    %c1 = arith.constant 1 : index
    %c0_103 = arith.constant 0 : index
    %c0_104 = arith.constant 0 : index
    %241 = vector.load %arg4[%c1, %c0_103, %c0_104] : memref<2x1x32xf32, #tpu.memory_space<vmem>>, vector<1x1x32xf32>
    %242 = vector.shape_cast %241 : vector<1x1x32xf32> to vector<1x32xf32>
    %c1_105 = arith.constant 1 : index
    %c0_106 = arith.constant 0 : index
    %c0_107 = arith.constant 0 : index
    %243 = vector.load %arg5[%c1_105, %c0_106, %c0_107] : memref<2x1x32xf32, #tpu.memory_space<vmem>>, vector<1x1x32xf32>
    %244 = vector.shape_cast %243 : vector<1x1x32xf32> to vector<1x32xf32>
    %cst_108 = arith.constant dense<0.000000e+00> : vector<8xf32>
    %245 = vector.multi_reduction <add>, %240, %cst_108 [1] : vector<8x32xf32> to vector<8xf32>
    %246 = vector.shape_cast %245 : vector<8xf32> to vector<8x1xf32>
    %cst_109 = arith.constant 3.200000e+01 : f32
    %247 = vector.broadcast %cst_109 : f32 to vector<8x1xf32>
    %248 = arith.divf %246, %247 : vector<8x1xf32>
    %249 = vector.broadcast %248 : vector<8x1xf32> to vector<8x32xf32>
    %250 = arith.subf %240, %249 : vector<8x32xf32>
    %251 = arith.mulf %250, %250 : vector<8x32xf32>
    %cst_110 = arith.constant dense<0.000000e+00> : vector<8xf32>
    %252 = vector.multi_reduction <add>, %251, %cst_110 [1] : vector<8x32xf32> to vector<8xf32>
    %253 = vector.shape_cast %252 : vector<8xf32> to vector<8x1xf32>
    %cst_111 = arith.constant 3.200000e+01 : f32
    %254 = vector.broadcast %cst_111 : f32 to vector<8x1xf32>
    %255 = arith.divf %253, %254 : vector<8x1xf32>
    %256 = vector.broadcast %248 : vector<8x1xf32> to vector<8x32xf32>
    %257 = arith.subf %240, %256 : vector<8x32xf32>
    %cst_112 = arith.constant 9.99999974E-6 : f32
    %258 = vector.broadcast %cst_112 : f32 to vector<8x1xf32>
    %259 = arith.addf %255, %258 : vector<8x1xf32>
    %260 = math.rsqrt %259 : vector<8x1xf32>
    %261 = vector.broadcast %260 : vector<8x1xf32> to vector<8x32xf32>
    %262 = arith.mulf %257, %261 : vector<8x32xf32>
    %263 = vector.broadcast %242 : vector<1x32xf32> to vector<8x32xf32>
    %264 = arith.mulf %262, %263 : vector<8x32xf32>
    %265 = vector.broadcast %244 : vector<1x32xf32> to vector<8x32xf32>
    %266 = arith.addf %264, %265 : vector<8x32xf32>
    %c1_113 = arith.constant 1 : index
    %c0_114 = arith.constant 0 : index
    %c0_115 = arith.constant 0 : index
    %267 = vector.load %arg6[%c1_113, %c0_114, %c0_115] : memref<2x32x32xf32, #tpu.memory_space<vmem>>, vector<1x32x32xf32>
    %268 = vector.shape_cast %267 : vector<1x32x32xf32> to vector<32x32xf32>
    %269 = arith.truncf %266 : vector<8x32xf32> to vector<8x32xbf16>
    %270 = arith.truncf %268 : vector<32x32xf32> to vector<32x32xbf16>
    %cst_116 = arith.constant dense<0.000000e+00> : vector<8x32xf32>
    %271 = tpu.matmul %269, %270, %cst_116 {dimension_numbers = #tpu.dot_dimension_numbers<[1], [0], [0], [1], [0, 0, 1, 1], [], []>} : vector<8x32xbf16>, vector<32x32xbf16>, vector<8x32xf32> -> vector<8x32xf32>
    %c1_117 = arith.constant 1 : index
    %c0_118 = arith.constant 0 : index
    %c0_119 = arith.constant 0 : index
    %272 = vector.load %arg9[%c1_117, %c0_118, %c0_119] : memref<2x1x32xf32, #tpu.memory_space<vmem>>, vector<1x1x32xf32>
    %273 = vector.shape_cast %272 : vector<1x1x32xf32> to vector<1x32xf32>
    %274 = vector.broadcast %273 : vector<1x32xf32> to vector<8x32xf32>
    %275 = arith.addf %271, %274 : vector<8x32xf32>
    %c1_120 = arith.constant 1 : index
    %c0_121 = arith.constant 0 : index
    %c0_122 = arith.constant 0 : index
    %276 = vector.load %arg7[%c1_120, %c0_121, %c0_122] : memref<2x32x32xf32, #tpu.memory_space<vmem>>, vector<1x32x32xf32>
    %277 = vector.shape_cast %276 : vector<1x32x32xf32> to vector<32x32xf32>
    %278 = arith.truncf %266 : vector<8x32xf32> to vector<8x32xbf16>
    %279 = arith.truncf %277 : vector<32x32xf32> to vector<32x32xbf16>
    %cst_123 = arith.constant dense<0.000000e+00> : vector<8x32xf32>
    %280 = tpu.matmul %278, %279, %cst_123 {dimension_numbers = #tpu.dot_dimension_numbers<[1], [0], [0], [1], [0, 0, 1, 1], [], []>} : vector<8x32xbf16>, vector<32x32xbf16>, vector<8x32xf32> -> vector<8x32xf32>
    %c1_124 = arith.constant 1 : index
    %c0_125 = arith.constant 0 : index
    %c0_126 = arith.constant 0 : index
    %281 = vector.load %arg10[%c1_124, %c0_125, %c0_126] : memref<2x1x32xf32, #tpu.memory_space<vmem>>, vector<1x1x32xf32>
    %282 = vector.shape_cast %281 : vector<1x1x32xf32> to vector<1x32xf32>
    %283 = vector.broadcast %282 : vector<1x32xf32> to vector<8x32xf32>
    %284 = arith.addf %280, %283 : vector<8x32xf32>
    %c1_127 = arith.constant 1 : index
    %c0_128 = arith.constant 0 : index
    %c0_129 = arith.constant 0 : index
    %285 = vector.load %arg8[%c1_127, %c0_128, %c0_129] : memref<2x32x32xf32, #tpu.memory_space<vmem>>, vector<1x32x32xf32>
    %286 = vector.shape_cast %285 : vector<1x32x32xf32> to vector<32x32xf32>
    %287 = arith.truncf %266 : vector<8x32xf32> to vector<8x32xbf16>
    %288 = arith.truncf %286 : vector<32x32xf32> to vector<32x32xbf16>
    %cst_130 = arith.constant dense<0.000000e+00> : vector<8x32xf32>
    %289 = tpu.matmul %287, %288, %cst_130 {dimension_numbers = #tpu.dot_dimension_numbers<[1], [0], [0], [1], [0, 0, 1, 1], [], []>} : vector<8x32xbf16>, vector<32x32xbf16>, vector<8x32xf32> -> vector<8x32xf32>
    %c1_131 = arith.constant 1 : index
    %c0_132 = arith.constant 0 : index
    %c0_133 = arith.constant 0 : index
    %290 = vector.load %arg11[%c1_131, %c0_132, %c0_133] : memref<2x1x32xf32, #tpu.memory_space<vmem>>, vector<1x1x32xf32>
    %291 = vector.shape_cast %290 : vector<1x1x32xf32> to vector<1x32xf32>
    %292 = vector.broadcast %291 : vector<1x32xf32> to vector<8x32xf32>
    %293 = arith.addf %289, %292 : vector<8x32xf32>
    %c1_134 = arith.constant 1 : index
    %c0_135 = arith.constant 0 : index
    %c0_136 = arith.constant 0 : index
    %294 = vector.load %arg12[%c1_134, %c0_135, %c0_136] : memref<2x32x32xf32, #tpu.memory_space<vmem>>, vector<1x32x32xf32>
    %295 = vector.shape_cast %294 : vector<1x32x32xf32> to vector<32x32xf32>
    %cst_137 = arith.constant 0.000000e+00 : f32
    %296 = vector.broadcast %cst_137 : f32 to vector<8x32xf32>
    %297 = vector.extract_strided_slice %275 {offsets = [0, 0], sizes = [8, 8], strides = [1, 1]} : vector<8x32xf32> to vector<8x8xf32>
    %298 = vector.extract_strided_slice %284 {offsets = [0, 0], sizes = [8, 8], strides = [1, 1]} : vector<8x32xf32> to vector<8x8xf32>
    %299 = arith.truncf %297 : vector<8x8xf32> to vector<8x8xbf16>
    %300 = arith.truncf %298 : vector<8x8xf32> to vector<8x8xbf16>
    %cst_138 = arith.constant dense<0.000000e+00> : vector<8x8xf32>
    %301 = tpu.matmul %299, %300, %cst_138 {dimension_numbers = #tpu.dot_dimension_numbers<[1], [1], [0], [0], [0, 0, 1, 0], [], []>} : vector<8x8xbf16>, vector<8x8xbf16>, vector<8x8xf32> -> vector<8x8xf32>
    %cst_139 = arith.constant 0.353553385 : f32
    %302 = vector.broadcast %cst_139 : f32 to vector<8x8xf32>
    %303 = arith.mulf %301, %302 : vector<8x8xf32>
    %cst_140 = arith.constant -1.000000e+30 : f32
    %304 = vector.broadcast %cst_140 : f32 to vector<8x8xf32>
    %305 = arith.select %14, %303, %304 : vector<8x8xi1>, vector<8x8xf32>
    %cst_141 = arith.constant dense<0xFF800000> : vector<8xf32>
    %306 = vector.multi_reduction <maximumf>, %305, %cst_141 [1] : vector<8x8xf32> to vector<8xf32>
    %307 = vector.shape_cast %306 : vector<8xf32> to vector<8x1xf32>
    %308 = vector.broadcast %307 : vector<8x1xf32> to vector<8x8xf32>
    %309 = arith.subf %305, %308 : vector<8x8xf32>
    %310 = math.exp %309 : vector<8x8xf32>
    %cst_142 = arith.constant dense<0.000000e+00> : vector<8xf32>
    %311 = vector.multi_reduction <add>, %310, %cst_142 [1] : vector<8x8xf32> to vector<8xf32>
    %312 = vector.shape_cast %311 : vector<8xf32> to vector<8x1xf32>
    %313 = tpu.reciprocal %312 {approx = true} : vector<8x1xf32> -> vector<8x1xf32>
    %314 = vector.broadcast %313 : vector<8x1xf32> to vector<8x8xf32>
    %315 = arith.mulf %310, %314 : vector<8x8xf32>
    %316 = vector.extract_strided_slice %293 {offsets = [0, 0], sizes = [8, 8], strides = [1, 1]} : vector<8x32xf32> to vector<8x8xf32>
    %317 = arith.truncf %315 : vector<8x8xf32> to vector<8x8xbf16>
    %318 = arith.truncf %316 : vector<8x8xf32> to vector<8x8xbf16>
    %cst_143 = arith.constant dense<0.000000e+00> : vector<8x8xf32>
    %319 = tpu.matmul %317, %318, %cst_143 {dimension_numbers = #tpu.dot_dimension_numbers<[1], [0], [0], [1], [0, 0, 1, 1], [], []>} : vector<8x8xbf16>, vector<8x8xbf16>, vector<8x8xf32> -> vector<8x8xf32>
    %320 = vector.extract_strided_slice %295 {offsets = [0, 0], sizes = [8, 32], strides = [1, 1]} : vector<32x32xf32> to vector<8x32xf32>
    %321 = arith.truncf %319 : vector<8x8xf32> to vector<8x8xbf16>
    %322 = arith.truncf %320 : vector<8x32xf32> to vector<8x32xbf16>
    %cst_144 = arith.constant dense<0.000000e+00> : vector<8x32xf32>
    %323 = tpu.matmul %321, %322, %cst_144 {dimension_numbers = #tpu.dot_dimension_numbers<[1], [0], [0], [1], [0, 0, 1, 1], [], []>} : vector<8x8xbf16>, vector<8x32xbf16>, vector<8x32xf32> -> vector<8x32xf32>
    %324 = arith.addf %296, %323 : vector<8x32xf32>
    %325 = vector.extract_strided_slice %275 {offsets = [0, 8], sizes = [8, 8], strides = [1, 1]} : vector<8x32xf32> to vector<8x8xf32>
    %326 = vector.extract_strided_slice %284 {offsets = [0, 8], sizes = [8, 8], strides = [1, 1]} : vector<8x32xf32> to vector<8x8xf32>
    %327 = arith.truncf %325 : vector<8x8xf32> to vector<8x8xbf16>
    %328 = arith.truncf %326 : vector<8x8xf32> to vector<8x8xbf16>
    %cst_145 = arith.constant dense<0.000000e+00> : vector<8x8xf32>
    %329 = tpu.matmul %327, %328, %cst_145 {dimension_numbers = #tpu.dot_dimension_numbers<[1], [1], [0], [0], [0, 0, 1, 0], [], []>} : vector<8x8xbf16>, vector<8x8xbf16>, vector<8x8xf32> -> vector<8x8xf32>
    %cst_146 = arith.constant 0.353553385 : f32
    %330 = vector.broadcast %cst_146 : f32 to vector<8x8xf32>
    %331 = arith.mulf %329, %330 : vector<8x8xf32>
    %cst_147 = arith.constant -1.000000e+30 : f32
    %332 = vector.broadcast %cst_147 : f32 to vector<8x8xf32>
    %333 = arith.select %14, %331, %332 : vector<8x8xi1>, vector<8x8xf32>
    %cst_148 = arith.constant dense<0xFF800000> : vector<8xf32>
    %334 = vector.multi_reduction <maximumf>, %333, %cst_148 [1] : vector<8x8xf32> to vector<8xf32>
    %335 = vector.shape_cast %334 : vector<8xf32> to vector<8x1xf32>
    %336 = vector.broadcast %335 : vector<8x1xf32> to vector<8x8xf32>
    %337 = arith.subf %333, %336 : vector<8x8xf32>
    %338 = math.exp %337 : vector<8x8xf32>
    %cst_149 = arith.constant dense<0.000000e+00> : vector<8xf32>
    %339 = vector.multi_reduction <add>, %338, %cst_149 [1] : vector<8x8xf32> to vector<8xf32>
    %340 = vector.shape_cast %339 : vector<8xf32> to vector<8x1xf32>
    %341 = tpu.reciprocal %340 {approx = true} : vector<8x1xf32> -> vector<8x1xf32>
    %342 = vector.broadcast %341 : vector<8x1xf32> to vector<8x8xf32>
    %343 = arith.mulf %338, %342 : vector<8x8xf32>
    %344 = vector.extract_strided_slice %293 {offsets = [0, 8], sizes = [8, 8], strides = [1, 1]} : vector<8x32xf32> to vector<8x8xf32>
    %345 = arith.truncf %343 : vector<8x8xf32> to vector<8x8xbf16>
    %346 = arith.truncf %344 : vector<8x8xf32> to vector<8x8xbf16>
    %cst_150 = arith.constant dense<0.000000e+00> : vector<8x8xf32>
    %347 = tpu.matmul %345, %346, %cst_150 {dimension_numbers = #tpu.dot_dimension_numbers<[1], [0], [0], [1], [0, 0, 1, 1], [], []>} : vector<8x8xbf16>, vector<8x8xbf16>, vector<8x8xf32> -> vector<8x8xf32>
    %348 = vector.extract_strided_slice %295 {offsets = [8, 0], sizes = [8, 32], strides = [1, 1]} : vector<32x32xf32> to vector<8x32xf32>
    %349 = arith.truncf %347 : vector<8x8xf32> to vector<8x8xbf16>
    %350 = arith.truncf %348 : vector<8x32xf32> to vector<8x32xbf16>
    %cst_151 = arith.constant dense<0.000000e+00> : vector<8x32xf32>
    %351 = tpu.matmul %349, %350, %cst_151 {dimension_numbers = #tpu.dot_dimension_numbers<[1], [0], [0], [1], [0, 0, 1, 1], [], []>} : vector<8x8xbf16>, vector<8x32xbf16>, vector<8x32xf32> -> vector<8x32xf32>
    %352 = arith.addf %324, %351 : vector<8x32xf32>
    %353 = vector.extract_strided_slice %275 {offsets = [0, 16], sizes = [8, 8], strides = [1, 1]} : vector<8x32xf32> to vector<8x8xf32>
    %354 = vector.extract_strided_slice %284 {offsets = [0, 16], sizes = [8, 8], strides = [1, 1]} : vector<8x32xf32> to vector<8x8xf32>
    %355 = arith.truncf %353 : vector<8x8xf32> to vector<8x8xbf16>
    %356 = arith.truncf %354 : vector<8x8xf32> to vector<8x8xbf16>
    %cst_152 = arith.constant dense<0.000000e+00> : vector<8x8xf32>
    %357 = tpu.matmul %355, %356, %cst_152 {dimension_numbers = #tpu.dot_dimension_numbers<[1], [1], [0], [0], [0, 0, 1, 0], [], []>} : vector<8x8xbf16>, vector<8x8xbf16>, vector<8x8xf32> -> vector<8x8xf32>
    %cst_153 = arith.constant 0.353553385 : f32
    %358 = vector.broadcast %cst_153 : f32 to vector<8x8xf32>
    %359 = arith.mulf %357, %358 : vector<8x8xf32>
    %cst_154 = arith.constant -1.000000e+30 : f32
    %360 = vector.broadcast %cst_154 : f32 to vector<8x8xf32>
    %361 = arith.select %14, %359, %360 : vector<8x8xi1>, vector<8x8xf32>
    %cst_155 = arith.constant dense<0xFF800000> : vector<8xf32>
    %362 = vector.multi_reduction <maximumf>, %361, %cst_155 [1] : vector<8x8xf32> to vector<8xf32>
    %363 = vector.shape_cast %362 : vector<8xf32> to vector<8x1xf32>
    %364 = vector.broadcast %363 : vector<8x1xf32> to vector<8x8xf32>
    %365 = arith.subf %361, %364 : vector<8x8xf32>
    %366 = math.exp %365 : vector<8x8xf32>
    %cst_156 = arith.constant dense<0.000000e+00> : vector<8xf32>
    %367 = vector.multi_reduction <add>, %366, %cst_156 [1] : vector<8x8xf32> to vector<8xf32>
    %368 = vector.shape_cast %367 : vector<8xf32> to vector<8x1xf32>
    %369 = tpu.reciprocal %368 {approx = true} : vector<8x1xf32> -> vector<8x1xf32>
    %370 = vector.broadcast %369 : vector<8x1xf32> to vector<8x8xf32>
    %371 = arith.mulf %366, %370 : vector<8x8xf32>
    %372 = vector.extract_strided_slice %293 {offsets = [0, 16], sizes = [8, 8], strides = [1, 1]} : vector<8x32xf32> to vector<8x8xf32>
    %373 = arith.truncf %371 : vector<8x8xf32> to vector<8x8xbf16>
    %374 = arith.truncf %372 : vector<8x8xf32> to vector<8x8xbf16>
    %cst_157 = arith.constant dense<0.000000e+00> : vector<8x8xf32>
    %375 = tpu.matmul %373, %374, %cst_157 {dimension_numbers = #tpu.dot_dimension_numbers<[1], [0], [0], [1], [0, 0, 1, 1], [], []>} : vector<8x8xbf16>, vector<8x8xbf16>, vector<8x8xf32> -> vector<8x8xf32>
    %376 = vector.extract_strided_slice %295 {offsets = [16, 0], sizes = [8, 32], strides = [1, 1]} : vector<32x32xf32> to vector<8x32xf32>
    %377 = arith.truncf %375 : vector<8x8xf32> to vector<8x8xbf16>
    %378 = arith.truncf %376 : vector<8x32xf32> to vector<8x32xbf16>
    %cst_158 = arith.constant dense<0.000000e+00> : vector<8x32xf32>
    %379 = tpu.matmul %377, %378, %cst_158 {dimension_numbers = #tpu.dot_dimension_numbers<[1], [0], [0], [1], [0, 0, 1, 1], [], []>} : vector<8x8xbf16>, vector<8x32xbf16>, vector<8x32xf32> -> vector<8x32xf32>
    %380 = arith.addf %352, %379 : vector<8x32xf32>
    %381 = vector.extract_strided_slice %275 {offsets = [0, 24], sizes = [8, 8], strides = [1, 1]} : vector<8x32xf32> to vector<8x8xf32>
    %382 = vector.extract_strided_slice %284 {offsets = [0, 24], sizes = [8, 8], strides = [1, 1]} : vector<8x32xf32> to vector<8x8xf32>
    %383 = arith.truncf %381 : vector<8x8xf32> to vector<8x8xbf16>
    %384 = arith.truncf %382 : vector<8x8xf32> to vector<8x8xbf16>
    %cst_159 = arith.constant dense<0.000000e+00> : vector<8x8xf32>
    %385 = tpu.matmul %383, %384, %cst_159 {dimension_numbers = #tpu.dot_dimension_numbers<[1], [1], [0], [0], [0, 0, 1, 0], [], []>} : vector<8x8xbf16>, vector<8x8xbf16>, vector<8x8xf32> -> vector<8x8xf32>
    %cst_160 = arith.constant 0.353553385 : f32
    %386 = vector.broadcast %cst_160 : f32 to vector<8x8xf32>
    %387 = arith.mulf %385, %386 : vector<8x8xf32>
    %cst_161 = arith.constant -1.000000e+30 : f32
    %388 = vector.broadcast %cst_161 : f32 to vector<8x8xf32>
    %389 = arith.select %14, %387, %388 : vector<8x8xi1>, vector<8x8xf32>
    %cst_162 = arith.constant dense<0xFF800000> : vector<8xf32>
    %390 = vector.multi_reduction <maximumf>, %389, %cst_162 [1] : vector<8x8xf32> to vector<8xf32>
    %391 = vector.shape_cast %390 : vector<8xf32> to vector<8x1xf32>
    %392 = vector.broadcast %391 : vector<8x1xf32> to vector<8x8xf32>
    %393 = arith.subf %389, %392 : vector<8x8xf32>
    %394 = math.exp %393 : vector<8x8xf32>
    %cst_163 = arith.constant dense<0.000000e+00> : vector<8xf32>
    %395 = vector.multi_reduction <add>, %394, %cst_163 [1] : vector<8x8xf32> to vector<8xf32>
    %396 = vector.shape_cast %395 : vector<8xf32> to vector<8x1xf32>
    %397 = tpu.reciprocal %396 {approx = true} : vector<8x1xf32> -> vector<8x1xf32>
    %398 = vector.broadcast %397 : vector<8x1xf32> to vector<8x8xf32>
    %399 = arith.mulf %394, %398 : vector<8x8xf32>
    %400 = vector.extract_strided_slice %293 {offsets = [0, 24], sizes = [8, 8], strides = [1, 1]} : vector<8x32xf32> to vector<8x8xf32>
    %401 = arith.truncf %399 : vector<8x8xf32> to vector<8x8xbf16>
    %402 = arith.truncf %400 : vector<8x8xf32> to vector<8x8xbf16>
    %cst_164 = arith.constant dense<0.000000e+00> : vector<8x8xf32>
    %403 = tpu.matmul %401, %402, %cst_164 {dimension_numbers = #tpu.dot_dimension_numbers<[1], [0], [0], [1], [0, 0, 1, 1], [], []>} : vector<8x8xbf16>, vector<8x8xbf16>, vector<8x8xf32> -> vector<8x8xf32>
    %404 = vector.extract_strided_slice %295 {offsets = [24, 0], sizes = [8, 32], strides = [1, 1]} : vector<32x32xf32> to vector<8x32xf32>
    %405 = arith.truncf %403 : vector<8x8xf32> to vector<8x8xbf16>
    %406 = arith.truncf %404 : vector<8x32xf32> to vector<8x32xbf16>
    %cst_165 = arith.constant dense<0.000000e+00> : vector<8x32xf32>
    %407 = tpu.matmul %405, %406, %cst_165 {dimension_numbers = #tpu.dot_dimension_numbers<[1], [0], [0], [1], [0, 0, 1, 1], [], []>} : vector<8x8xbf16>, vector<8x32xbf16>, vector<8x32xf32> -> vector<8x32xf32>
    %408 = arith.addf %380, %407 : vector<8x32xf32>
    %409 = arith.addf %240, %408 : vector<8x32xf32>
    %c1_166 = arith.constant 1 : index
    %c0_167 = arith.constant 0 : index
    %c0_168 = arith.constant 0 : index
    %410 = vector.load %arg13[%c1_166, %c0_167, %c0_168] : memref<2x1x32xf32, #tpu.memory_space<vmem>>, vector<1x1x32xf32>
    %411 = vector.shape_cast %410 : vector<1x1x32xf32> to vector<1x32xf32>
    %412 = vector.broadcast %411 : vector<1x32xf32> to vector<8x32xf32>
    %413 = arith.addf %409, %412 : vector<8x32xf32>
    %c1_169 = arith.constant 1 : index
    %c0_170 = arith.constant 0 : index
    %c0_171 = arith.constant 0 : index
    %414 = vector.load %arg14[%c1_169, %c0_170, %c0_171] : memref<2x1x32xf32, #tpu.memory_space<vmem>>, vector<1x1x32xf32>
    %415 = vector.shape_cast %414 : vector<1x1x32xf32> to vector<1x32xf32>
    %c1_172 = arith.constant 1 : index
    %c0_173 = arith.constant 0 : index
    %c0_174 = arith.constant 0 : index
    %416 = vector.load %arg15[%c1_172, %c0_173, %c0_174] : memref<2x1x32xf32, #tpu.memory_space<vmem>>, vector<1x1x32xf32>
    %417 = vector.shape_cast %416 : vector<1x1x32xf32> to vector<1x32xf32>
    %cst_175 = arith.constant dense<0.000000e+00> : vector<8xf32>
    %418 = vector.multi_reduction <add>, %413, %cst_175 [1] : vector<8x32xf32> to vector<8xf32>
    %419 = vector.shape_cast %418 : vector<8xf32> to vector<8x1xf32>
    %cst_176 = arith.constant 3.200000e+01 : f32
    %420 = vector.broadcast %cst_176 : f32 to vector<8x1xf32>
    %421 = arith.divf %419, %420 : vector<8x1xf32>
    %422 = vector.broadcast %421 : vector<8x1xf32> to vector<8x32xf32>
    %423 = arith.subf %413, %422 : vector<8x32xf32>
    %424 = arith.mulf %423, %423 : vector<8x32xf32>
    %cst_177 = arith.constant dense<0.000000e+00> : vector<8xf32>
    %425 = vector.multi_reduction <add>, %424, %cst_177 [1] : vector<8x32xf32> to vector<8xf32>
    %426 = vector.shape_cast %425 : vector<8xf32> to vector<8x1xf32>
    %cst_178 = arith.constant 3.200000e+01 : f32
    %427 = vector.broadcast %cst_178 : f32 to vector<8x1xf32>
    %428 = arith.divf %426, %427 : vector<8x1xf32>
    %429 = vector.broadcast %421 : vector<8x1xf32> to vector<8x32xf32>
    %430 = arith.subf %413, %429 : vector<8x32xf32>
    %cst_179 = arith.constant 9.99999974E-6 : f32
    %431 = vector.broadcast %cst_179 : f32 to vector<8x1xf32>
    %432 = arith.addf %428, %431 : vector<8x1xf32>
    %433 = math.rsqrt %432 : vector<8x1xf32>
    %434 = vector.broadcast %433 : vector<8x1xf32> to vector<8x32xf32>
    %435 = arith.mulf %430, %434 : vector<8x32xf32>
    %436 = vector.broadcast %415 : vector<1x32xf32> to vector<8x32xf32>
    %437 = arith.mulf %435, %436 : vector<8x32xf32>
    %438 = vector.broadcast %417 : vector<1x32xf32> to vector<8x32xf32>
    %439 = arith.addf %437, %438 : vector<8x32xf32>
    %c1_180 = arith.constant 1 : index
    %c0_181 = arith.constant 0 : index
    %c0_182 = arith.constant 0 : index
    %440 = vector.load %arg16[%c1_180, %c0_181, %c0_182] : memref<2x32x128xf32, #tpu.memory_space<vmem>>, vector<1x32x128xf32>
    %441 = vector.shape_cast %440 : vector<1x32x128xf32> to vector<32x128xf32>
    %442 = arith.truncf %439 : vector<8x32xf32> to vector<8x32xbf16>
    %443 = arith.truncf %441 : vector<32x128xf32> to vector<32x128xbf16>
    %cst_183 = arith.constant dense<0.000000e+00> : vector<8x128xf32>
    %444 = tpu.matmul %442, %443, %cst_183 {dimension_numbers = #tpu.dot_dimension_numbers<[1], [0], [0], [1], [0, 0, 1, 1], [], []>} : vector<8x32xbf16>, vector<32x128xbf16>, vector<8x128xf32> -> vector<8x128xf32>
    %c1_184 = arith.constant 1 : index
    %c0_185 = arith.constant 0 : index
    %c0_186 = arith.constant 0 : index
    %445 = vector.load %arg17[%c1_184, %c0_185, %c0_186] : memref<2x1x128xf32, #tpu.memory_space<vmem>>, vector<1x1x128xf32>
    %446 = vector.shape_cast %445 : vector<1x1x128xf32> to vector<1x128xf32>
    %447 = vector.broadcast %446 : vector<1x128xf32> to vector<8x128xf32>
    %448 = arith.addf %444, %447 : vector<8x128xf32>
    %cst_187 = arith.constant 5.000000e-01 : f32
    %449 = vector.broadcast %cst_187 : f32 to vector<8x128xf32>
    %450 = arith.mulf %449, %448 : vector<8x128xf32>
    %cst_188 = arith.constant 0.707106769 : f32
    %451 = vector.broadcast %cst_188 : f32 to vector<8x128xf32>
    %452 = arith.mulf %448, %451 : vector<8x128xf32>
    %453 = math.erf %452 : vector<8x128xf32>
    %cst_189 = arith.constant 1.000000e+00 : f32
    %454 = vector.broadcast %cst_189 : f32 to vector<8x128xf32>
    %455 = arith.addf %454, %453 : vector<8x128xf32>
    %456 = arith.mulf %450, %455 : vector<8x128xf32>
    %c1_190 = arith.constant 1 : index
    %c0_191 = arith.constant 0 : index
    %c0_192 = arith.constant 0 : index
    %457 = vector.load %arg18[%c1_190, %c0_191, %c0_192] : memref<2x128x32xf32, #tpu.memory_space<vmem>>, vector<1x128x32xf32>
    %458 = vector.shape_cast %457 : vector<1x128x32xf32> to vector<128x32xf32>
    %459 = arith.truncf %456 : vector<8x128xf32> to vector<8x128xbf16>
    %460 = arith.truncf %458 : vector<128x32xf32> to vector<128x32xbf16>
    %cst_193 = arith.constant dense<0.000000e+00> : vector<8x32xf32>
    %461 = tpu.matmul %459, %460, %cst_193 {dimension_numbers = #tpu.dot_dimension_numbers<[1], [0], [0], [1], [0, 0, 1, 1], [], []>} : vector<8x128xbf16>, vector<128x32xbf16>, vector<8x32xf32> -> vector<8x32xf32>
    %462 = arith.addf %413, %461 : vector<8x32xf32>
    %c1_194 = arith.constant 1 : index
    %c0_195 = arith.constant 0 : index
    %c0_196 = arith.constant 0 : index
    %463 = vector.load %arg19[%c1_194, %c0_195, %c0_196] : memref<2x1x32xf32, #tpu.memory_space<vmem>>, vector<1x1x32xf32>
    %464 = vector.shape_cast %463 : vector<1x1x32xf32> to vector<1x32xf32>
    %465 = vector.broadcast %464 : vector<1x32xf32> to vector<8x32xf32>
    %466 = arith.addf %462, %465 : vector<8x32xf32>
    %c0_197 = arith.constant 0 : index
    %c0_198 = arith.constant 0 : index
    %467 = vector.load %arg20[%c0_197, %c0_198] : memref<1x32xf32, #tpu.memory_space<vmem>>, vector<1x32xf32>
    %c0_199 = arith.constant 0 : index
    %c0_200 = arith.constant 0 : index
    %468 = vector.load %arg21[%c0_199, %c0_200] : memref<1x32xf32, #tpu.memory_space<vmem>>, vector<1x32xf32>
    %cst_201 = arith.constant dense<0.000000e+00> : vector<8xf32>
    %469 = vector.multi_reduction <add>, %466, %cst_201 [1] : vector<8x32xf32> to vector<8xf32>
    %470 = vector.shape_cast %469 : vector<8xf32> to vector<8x1xf32>
    %cst_202 = arith.constant 3.200000e+01 : f32
    %471 = vector.broadcast %cst_202 : f32 to vector<8x1xf32>
    %472 = arith.divf %470, %471 : vector<8x1xf32>
    %473 = vector.broadcast %472 : vector<8x1xf32> to vector<8x32xf32>
    %474 = arith.subf %466, %473 : vector<8x32xf32>
    %475 = arith.mulf %474, %474 : vector<8x32xf32>
    %cst_203 = arith.constant dense<0.000000e+00> : vector<8xf32>
    %476 = vector.multi_reduction <add>, %475, %cst_203 [1] : vector<8x32xf32> to vector<8xf32>
    %477 = vector.shape_cast %476 : vector<8xf32> to vector<8x1xf32>
    %cst_204 = arith.constant 3.200000e+01 : f32
    %478 = vector.broadcast %cst_204 : f32 to vector<8x1xf32>
    %479 = arith.divf %477, %478 : vector<8x1xf32>
    %480 = vector.broadcast %472 : vector<8x1xf32> to vector<8x32xf32>
    %481 = arith.subf %466, %480 : vector<8x32xf32>
    %cst_205 = arith.constant 9.99999974E-6 : f32
    %482 = vector.broadcast %cst_205 : f32 to vector<8x1xf32>
    %483 = arith.addf %479, %482 : vector<8x1xf32>
    %484 = math.rsqrt %483 : vector<8x1xf32>
    %485 = vector.broadcast %484 : vector<8x1xf32> to vector<8x32xf32>
    %486 = arith.mulf %481, %485 : vector<8x32xf32>
    %487 = vector.broadcast %467 : vector<1x32xf32> to vector<8x32xf32>
    %488 = arith.mulf %486, %487 : vector<8x32xf32>
    %489 = vector.broadcast %468 : vector<1x32xf32> to vector<8x32xf32>
    %490 = arith.addf %488, %489 : vector<8x32xf32>
    %c0_206 = arith.constant 0 : index
    %c0_207 = arith.constant 0 : index
    %491 = vector.load %arg2[%c0_206, %c0_207] : memref<64x32xf32, #tpu.memory_space<vmem>>, vector<64x32xf32>
    %492 = arith.truncf %490 : vector<8x32xf32> to vector<8x32xbf16>
    %493 = arith.truncf %491 : vector<64x32xf32> to vector<64x32xbf16>
    %cst_208 = arith.constant dense<0.000000e+00> : vector<8x64xf32>
    %494 = tpu.matmul %492, %493, %cst_208 {dimension_numbers = #tpu.dot_dimension_numbers<[1], [1], [0], [0], [0, 0, 1, 0], [], []>} : vector<8x32xbf16>, vector<64x32xbf16>, vector<8x64xf32> -> vector<8x64xf32>
    %c0_209 = arith.constant 0 : index
    %c0_210 = arith.constant 0 : index
    %c0_211 = arith.constant 0 : index
    %495 = vector.load %arg22[%c0_209, %c0_210, %c0_211] : memref<1x8x64xf32, #tpu.memory_space<vmem>>, vector<1x8x64xf32>
    %496 = vector.shape_cast %495 : vector<1x8x64xf32> to vector<8x64xf32>
    %497 = vector.shape_cast %494 : vector<8x64xf32> to vector<1x8x64xf32>
    tpu.vector_store %arg22[%c0_209, %c0_210, %c0_211], %497 {strides = array<i32>} : memref<1x8x64xf32, #tpu.memory_space<vmem>>, vector<1x8x64xf32>,
    return
  }
  func.func @transform_0(%arg0: i32) -> (i32, i32, i32) {
    %c0_i32 = arith.constant 0 : i32
    %c0_i32_0 = arith.constant 0 : i32
    %c0_i32_1 = arith.constant 0 : i32
    return %arg0, %c0_i32, %c0_i32_0 : i32, i32, i32
  }
  func.func @transform_1(%arg0: i32) -> (i32, i32) {
    %c0_i32 = arith.constant 0 : i32
    %c0_i32_0 = arith.constant 0 : i32
    %c0_i32_1 = arith.constant 0 : i32
    return %c0_i32, %c0_i32_0 : i32, i32
  }
  func.func @transform_2(%arg0: i32) -> (i32, i32) {
    %c0_i32 = arith.constant 0 : i32
    %c0_i32_0 = arith.constant 0 : i32
    %c0_i32_1 = arith.constant 0 : i32
    return %c0_i32, %c0_i32_0 : i32, i32
  }
  func.func @transform_3(%arg0: i32) -> (i32, i32, i32) {
    %c0_i32 = arith.constant 0 : i32
    %c0_i32_0 = arith.constant 0 : i32
    %c0_i32_1 = arith.constant 0 : i32
    %c0_i32_2 = arith.constant 0 : i32
    return %c0_i32, %c0_i32_0, %c0_i32_1 : i32, i32, i32
  }
  func.func @transform_4(%arg0: i32) -> (i32, i32, i32) {
    %c0_i32 = arith.constant 0 : i32
    %c0_i32_0 = arith.constant 0 : i32
    %c0_i32_1 = arith.constant 0 : i32
    %c0_i32_2 = arith.constant 0 : i32
    return %c0_i32, %c0_i32_0, %c0_i32_1 : i32, i32, i32
  }
  func.func @transform_5(%arg0: i32) -> (i32, i32, i32) {
    %c0_i32 = arith.constant 0 : i32
    %c0_i32_0 = arith.constant 0 : i32
    %c0_i32_1 = arith.constant 0 : i32
    %c0_i32_2 = arith.constant 0 : i32
    return %c0_i32, %c0_i32_0, %c0_i32_1 : i32, i32, i32
  }
  func.func @transform_6(%arg0: i32) -> (i32, i32, i32) {
    %c0_i32 = arith.constant 0 : i32
    %c0_i32_0 = arith.constant 0 : i32
    %c0_i32_1 = arith.constant 0 : i32
    %c0_i32_2 = arith.constant 0 : i32
    return %c0_i32, %c0_i32_0, %c0_i32_1 : i32, i32, i32
  }
  func.func @transform_7(%arg0: i32) -> (i32, i32, i32) {
    %c0_i32 = arith.constant 0 : i32
    %c0_i32_0 = arith.constant 0 : i32
    %c0_i32_1 = arith.constant 0 : i32
    %c0_i32_2 = arith.constant 0 : i32
    return %c0_i32, %c0_i32_0, %c0_i32_1 : i32, i32, i32
  }
  func.func @transform_8(%arg0: i32) -> (i32, i32, i32) {
    %c0_i32 = arith.constant 0 : i32
    %c0_i32_0 = arith.constant 0 : i32
    %c0_i32_1 = arith.constant 0 : i32
    %c0_i32_2 = arith.constant 0 : i32
    return %c0_i32, %c0_i32_0, %c0_i32_1 : i32, i32, i32
  }
  func.func @transform_9(%arg0: i32) -> (i32, i32, i32) {
    %c0_i32 = arith.constant 0 : i32
    %c0_i32_0 = arith.constant 0 : i32
    %c0_i32_1 = arith.constant 0 : i32
    %c0_i32_2 = arith.constant 0 : i32
    return %c0_i32, %c0_i32_0, %c0_i32_1 : i32, i32, i32
  }
  func.func @transform_10(%arg0: i32) -> (i32, i32, i32) {
    %c0_i32 = arith.constant 0 : i32
    %c0_i32_0 = arith.constant 0 : i32
    %c0_i32_1 = arith.constant 0 : i32
    %c0_i32_2 = arith.constant 0 : i32
    return %c0_i32, %c0_i32_0, %c0_i32_1 : i32, i32, i32
  }
  func.func @transform_11(%arg0: i32) -> (i32, i32, i32) {
    %c0_i32 = arith.constant 0 : i32
    %c0_i32_0 = arith.constant 0 : i32
    %c0_i32_1 = arith.constant 0 : i32
    %c0_i32_2 = arith.constant 0 : i32
    return %c0_i32, %c0_i32_0, %c0_i32_1 : i32, i32, i32
  }
  func.func @transform_12(%arg0: i32) -> (i32, i32, i32) {
    %c0_i32 = arith.constant 0 : i32
    %c0_i32_0 = arith.constant 0 : i32
    %c0_i32_1 = arith.constant 0 : i32
    %c0_i32_2 = arith.constant 0 : i32
    return %c0_i32, %c0_i32_0, %c0_i32_1 : i32, i32, i32
  }
  func.func @transform_13(%arg0: i32) -> (i32, i32, i32) {
    %c0_i32 = arith.constant 0 : i32
    %c0_i32_0 = arith.constant 0 : i32
    %c0_i32_1 = arith.constant 0 : i32
    %c0_i32_2 = arith.constant 0 : i32
    return %c0_i32, %c0_i32_0, %c0_i32_1 : i32, i32, i32
  }
  func.func @transform_14(%arg0: i32) -> (i32, i32, i32) {
    %c0_i32 = arith.constant 0 : i32
    %c0_i32_0 = arith.constant 0 : i32
    %c0_i32_1 = arith.constant 0 : i32
    %c0_i32_2 = arith.constant 0 : i32
    return %c0_i32, %c0_i32_0, %c0_i32_1 : i32, i32, i32
  }
  func.func @transform_15(%arg0: i32) -> (i32, i32, i32) {
    %c0_i32 = arith.constant 0 : i32
    %c0_i32_0 = arith.constant 0 : i32
    %c0_i32_1 = arith.constant 0 : i32
    %c0_i32_2 = arith.constant 0 : i32
    return %c0_i32, %c0_i32_0, %c0_i32_1 : i32, i32, i32
  }
  func.func @transform_16(%arg0: i32) -> (i32, i32, i32) {
    %c0_i32 = arith.constant 0 : i32
    %c0_i32_0 = arith.constant 0 : i32
    %c0_i32_1 = arith.constant 0 : i32
    %c0_i32_2 = arith.constant 0 : i32
    return %c0_i32, %c0_i32_0, %c0_i32_1 : i32, i32, i32
  }
  func.func @transform_17(%arg0: i32) -> (i32, i32, i32) {
    %c0_i32 = arith.constant 0 : i32
    %c0_i32_0 = arith.constant 0 : i32
    %c0_i32_1 = arith.constant 0 : i32
    %c0_i32_2 = arith.constant 0 : i32
    return %c0_i32, %c0_i32_0, %c0_i32_1 : i32, i32, i32
  }
  func.func @transform_18(%arg0: i32) -> (i32, i32, i32) {
    %c0_i32 = arith.constant 0 : i32
    %c0_i32_0 = arith.constant 0 : i32
    %c0_i32_1 = arith.constant 0 : i32
    %c0_i32_2 = arith.constant 0 : i32
    return %c0_i32, %c0_i32_0, %c0_i32_1 : i32, i32, i32
  }
  func.func @transform_19(%arg0: i32) -> (i32, i32) {
    %c0_i32 = arith.constant 0 : i32
    %c0_i32_0 = arith.constant 0 : i32
    %c0_i32_1 = arith.constant 0 : i32
    return %c0_i32, %c0_i32_0 : i32, i32
  }
  func.func @transform_20(%arg0: i32) -> (i32, i32) {
    %c0_i32 = arith.constant 0 : i32
    %c0_i32_0 = arith.constant 0 : i32
    %c0_i32_1 = arith.constant 0 : i32
    return %c0_i32, %c0_i32_0 : i32, i32
  }
  func.func @transform_21(%arg0: i32) -> (i32, i32, i32) {
    %c0_i32 = arith.constant 0 : i32
    %c0_i32_0 = arith.constant 0 : i32
    %c0_i32_1 = arith.constant 0 : i32
    return %arg0, %c0_i32, %c0_i32_0 : i32, i32, i32
  }
}

</mosaic_0001>

<bundles_post_ra>
// kernel: gpt_forward.1
= control target key start
LH: loop header
LB: loop body
LE: loop exit
PB: predicated region body
PF: predicated region fallthrough
CT: control target
= control target key end

     0   :  { %s3038_s0 = inlined_call_operand.vmem [shape: s32[2,8,1], index: 0, kind: input, shape index: {}]   ;;  %s3039_s1 = inlined_call_operand.vmem [shape: f32[64,32], index: 1, kind: input, shape index: {}]   ;;  %s3040_s2 = inlined_call_operand.vmem [shape: f32[16,32], index: 2, kind: input, shape index: {}]   ;;  %s3041_s3 = inlined_call_operand.vmem [shape: f32[2,1,32], index: 3, kind: input, shape index: {}]   ;;  %s3042_s4 = inlined_call_operand.vmem [shape: f32[2,1,32], index: 4, kind: input, shape index: {}]   ;;  %s3043_s5 = inlined_call_operand.vmem [shape: f32[2,32,32], index: 5, kind: input, shape index: {}]   ;;  %s3044_s6 = inlined_call_operand.vmem [shape: f32[2,32,32], index: 6, kind: input, shape index: {}]   ;;  %s3045_s7 = inlined_call_operand.vmem [shape: f32[2,32,32], index: 7, kind: input, shape index: {}]   ;;  %s3046_s8 = inlined_call_operand.vmem [shape: f32[2,1,32], index: 8, kind: input, shape index: {}]   ;;  %s3047_s9 = inlined_call_operand.vmem [shape: f32[2,1,32], index: 9, kind: input, shape index: {}]   ;;  %s3048_s10 = inlined_call_operand.vmem [shape: f32[2,1,32], index: 10, kind: input, shape index: {}]   ;;  %s3049_s11 = inlined_call_operand.vmem [shape: f32[2,32,32], index: 11, kind: input, shape index: {}]   ;;  %s3050_s12 = inlined_call_operand.vmem [shape: f32[2,1,32], index: 12, kind: input, shape index: {}]   ;;  %s3051_s13 = inlined_call_operand.vmem [shape: f32[2,1,32], index: 13, kind: input, shape index: {}]   ;;  %s3052_s14 = inlined_call_operand.vmem [shape: f32[2,1,32], index: 14, kind: input, shape index: {}]   ;;  %s3053_s15 = inlined_call_operand.vmem [shape: f32[2,32,128], index: 15, kind: input, shape index: {}]   ;;  %s3054_s16 = inlined_call_operand.vmem [shape: f32[2,1,128], index: 16, kind: input, shape index: {}]   ;;  %s3055_s17 = inlined_call_operand.vmem [shape: f32[2,128,32], index: 17, kind: input, shape index: {}]   ;;  %s3056_s18 = inlined_call_operand.vmem [shape: f32[2,1,32], index: 18, kind: input, shape index: {}]   ;;  %s3057_s19 = inlined_call_operand.vmem [shape: f32[1,32], index: 19, kind: input, shape index: {}]   ;;  %s3058_s20 = inlined_call_operand.vmem [shape: f32[1,32], index: 20, kind: input, shape index: {}]   ;;  %s3059_s21 = inlined_call_operand.hbm [shape: f32[2,8,64], index: 21, kind: output, shape index: {}]  }
   0x1   :  { %3080 = sst [smem:[#allocation12_spill]] %s3038_s0 }
   0x2   :  { %3081 = sst [smem:[#allocation13_spill]] %s3039_s1 }
   0x3   :  { %3082 = sst [smem:[#allocation14_spill]] %s3040_s2 }
   0x4   :  { %3083 = sst [smem:[#allocation15_spill]] %s3041_s3 }
   0x5   :  { %3084 = sst [smem:[#allocation16_spill]] %s3042_s4 }
   0x6   :  { %3085 = sst [smem:[#allocation17_spill]] %s3043_s5 }
   0x7   :  { %3086 = sst [smem:[#allocation18_spill]] %s3044_s6 }
   0x8   :  { %3087 = sst [smem:[#allocation19_spill]] %s3045_s7 }
   0x9   :  { %3088 = sst [smem:[#allocation20_spill]] %s3046_s8 }
   0xa   :  { %3089 = sst [smem:[#allocation21_spill]] %s3058_s20 }
   0xb   :  { %3090 = sst [smem:[#allocation22_spill]] %s3059_s21 }
   0xc   :  { %26 = vsyncpa [#allocation3], 0 }
   0xd   :  { %28 = vsyncpa [#allocation3 + $0x1], 0  ;;  %s2414_s2 = smov 0   ;;  %s2416_s25 = smov 0  }
   0xe   :  { %s2418_s26 = smov 0   ;;  %s2420_s27 = smov 0  }
   0xf LB: > { %3091 = sst [smem:[#allocation5_spill]] %s2284_s2  ;;  %s2435_s3 = sadd.s32 4294967295, %s2296_s27   ;;  %s2296_s27 = sphi %s2420_s27, %s3122_s27   ;;  %s2292_s26 = sphi %s2418_s26, %s3124_s26   ;;  %s2288_s25 = sphi %s2416_s25, %s3126_s25   ;;  %s2284_s2 = sphi %s2414_s2, %s3125_s2  }
  0x10   : > { %3092 = sst [smem:[#allocation6_spill]] %s2292_s26  ;;  %s2024_s28 = sadd.s32 4294967294, %s2296_s27  }
  0x11   : > { %3093 = sst [smem:[#allocation7_spill]] %s2296_s27  ;;  %s2439_s29 = sadd.s32 1, %s2296_s27  }
  0x12   : > { %3094 = sst [smem:[#allocation8_spill]] %s2439_s29  ;;  %s487_s0 = sadd.s32 1, %s2292_s26 }
  0x13   : > { %s484_s4 = ssub.s32 %s2296_s27, %s2439_s29  ;;  %p497_p0 = scmp.ne.s32.totalorder %s2292_s26, %s2288_s25 }
  0x14   : > { %p485_p1 = scmp.eq.s32.totalorder %s484_s4, 0  ;;  %p498_p2 = scmp.eq.s32.totalorder %s2435_s3, 1 }
  0x15   : > { %p503_p3 = scmp.ne.s32.totalorder %s2288_s25, %s2284_s2  ;;  %p504_p4 = scmp.eq.s32.totalorder %s2024_s28, 1 }
  0x16   : > { %s2450_s30 = scalar_select %p485_p1, %s2292_s26, %s487_s0  }
  0x17   : > { %p2452_p5 = por %p498_p2, %p497_p0  ;;  %p2456_p6 = por %p504_p4, %p503_p3 }
  0x18   : > { %3095 = sst [smem:[#allocation9_spill]] %s2450_s30  ;;  %p2027_p7 = scmp.ge.s32.totalorder %s2296_s27, 1 }
  0x19   : > { %s3096_s5 = scalar_select %p2452_p5, 1, 0 }
  0x1a   : > { %s3098_s22 = scalar_select %p2456_p6, 1, 0 }
  0x1b   : > { %3097 = sst [smem:[#allocation10_spill]] %s3096_s5  ;;  %p589_p8 = scmp.lt.s32.totalorder %s2296_s27, 3 }
  0x1c   : > { %3099 = sst [smem:[#allocation11_spill]] %s3098_s22 }
  0x1d   : > { %p590_p9 = pnand %p2027_p7, %p589_p8 }
  0x1e   : > { %p648_p10 = scmp.lt.s32.totalorder (!%p590_p9), %s2435_s3, 1  ;;  %s3100_s24 = sld [smem:[#allocation13_spill]] (!%p590_p9) }
  0x1f   : > { %593 = sbr.rel (%p590_p9) target bundleno = 5085 (0x13dd), region = 104  ;;  %s3101_s28 = sld [smem:[#allocation12_spill]] (!%p590_p9) }
  0x20   : > { %s3102_s1 = sld [smem:[#allocation14_spill]] (!%p590_p9)  ;;  %s3075_s2 = smov (!%p590_p9), 112  }
  0x21   : > { %s3104_s6 = sld [smem:[#allocation18_spill]] (!%p590_p9)  ;;  %s645_s22 = sand.u32 (!%p590_p9), 1, %s2288_s25  }
  0x22   : > { %s3105_s7 = sld [smem:[#allocation19_spill]] (!%p590_p9)  ;;  %s2113_s20 = sshll.u32 (!%p590_p9), %s2435_s3, 3 }
  0x23   : > { %s3108_s27 = sld [smem:[#allocation16_spill]] (!%p590_p9)  ;;  %s2028_s30 = sshll.u32 (!%p590_p9), %s645_s22, 3 }
  0x24   : > { %v2466_v0 = vld [vmem:[%s3100_s24 + $0x38] sm:$0xff]  ;;  %v2471_v1 = vld [vmem:[%s3100_s24 + $0x30] sm:$0xff]  ;;  %v2476_v2 = vld [vmem:[%s3100_s24 + $0x28] sm:$0xff]  ;;  %v2298_v3 = vmov 0   ;;  %s649_s26 = scalar_select %p648_p10, %s2435_s3, 1  ;;  %v654_v13 = vlaneseq  ;;  %vm670_vm0 = vcmask 523264  }
  0x25   : > { %2161 = vset.pattern.permute.xlu0 %v2298_v3  ;;  %682 = vmatpush.msra.mxu1 %v2466_v0  ;;  %v1919_v4 = vpack.c.bf16 %v2466_v0, %v2471_v1  ;;  %v2484_v5 = vld [vmem:[%s3100_s24 + $0x20] sm:$0xff]  ;;  %v2489_v6 = vld [vmem:[%s3100_s24 + $0x18] sm:$0xff]  ;;  %v2494_v7 = vld [vmem:[%s3100_s24 + $0x10] sm:$0xff]  ;;  %v2299_v16 = vmov 0.0   ;;  %vm699_vm2 = vcmask 261120   ;;  %v2300_v22 = vmov 32.0  }
  0x26   : > { %v1918_v8 = vpack.c.bf16 %v2476_v2, %v2484_v5  ;;  %v1917_v9 = vpack.c.bf16 %v2489_v6, %v2494_v7  ;;  %s2029_s23 = sshll.u32 %s649_s26, 3  ;;  %v662_v11 = vld [vmem:[%s3100_s24 + $0x8] sm:$0xff]  ;;  %v661_v12 = vld [vmem:[%s3100_s24] sm:$0xff]  ;;  %v2516_v14 = vand.u32 127, %v654_v13  ;;  %2184 = vrcp.f32 %v2300_v22  ;;  %s3106_s26 = sld [smem:[#allocation15_spill]] }
  0x27   : > { %683 = vmatpush.msra.mxu1 %v2471_v1  ;;  %s651_s0 = scalar_lea.vmem %s3101_s28, %s2029_s23  ;;  %v669_v18 = vld [vmem:[%s3102_s1] sm:$0xff]  ;;  %v766_v36 = vld [vmem:[%s3104_s6 + $0x10] sm:$0xff]  ;;  %v767_v38 = vld [vmem:[%s3104_s6 + $0x18] sm:$0xff]  ;;  %vm816_vm7 = vcmask 64512   ;;  %s3110_s8 = sld [smem:[#allocation20_spill]]  ;;  %vm854_vm8 = vcmask 1043456  }
  0x28   : > { %v653_v10 = vld [vmem:[%s651_s0] sm:$0xff]  ;;  %s3103_s0 = sld [smem:[#allocation17_spill]]  ;;  %v789_v39 = vld [vmem:[%s3105_s7 + $0x10] sm:$0xff]  ;;  %v790_v40 = vld [vmem:[%s3105_s7 + $0x18] sm:$0xff]  ;;  %v769_v41 = vpack.c.bf16 %v767_v38, %v766_v36  ;;  %s3073_s23 = smov 120   ;;  %v1927_v0 = vsel %vm699_vm2, %v1917_v9, 0 }
  0x29   : > { %684 = vmatpush.msra.mxu1 %v2476_v2  ;;  %657 = vperm.xlu0 %2161, %v653_v10   ;;  %v792_v42 = vpack.c.bf16 %v790_v40, %v789_v39  ;;  %v764_v45 = vld [vmem:[%s3104_s6] sm:$0xff]  ;;  %v765_v47 = vld [vmem:[%s3104_s6 + $0x8] sm:$0xff]  ;;  %s3109_s21 = smov %s3108_s27  ;;  %s3116_s1 = sld [smem:[#allocation21_spill]] }
  0x2a   : > { %v787_v48 = vld [vmem:[%s3105_s7] sm:$0xff]  ;;  %v788_v49 = vld [vmem:[%s3105_s7 + $0x8] sm:$0xff]  ;;  %780 = vmatpush.bf16.msra.mxu2 %v769_v41  ;;  %v768_v50 = vpack.c.bf16 %v765_v47, %v764_v45  ;;  %s3118_s5 = sld [smem:[#allocation22_spill]] }
  0x2b   : > { %685 = vmatpush.msra.mxu1 %v2484_v5  ;;  %803 = vmatpush.bf16.msra.mxu3 %v792_v42  ;;  %v791_v51 = vpack.c.bf16 %v788_v49, %v787_v48  ;;  %v2163_v3 = vld [vmem:[%s3108_s27] ss:$0 sm:$0xff]  ;;  %s3071_s27 = smov 104   ;;  %v2232_v1 = vld [vmem:[%s3100_s24 + $0x8] sm:$0xff] }
  0x2c   : > { %v2185_v23 = vpop.eup %2184  ;;  %s3107_s29 = smov %s3106_s26  ;;  %v2162_v61 = vld [vmem:[%s3106_s26] ss:$0 sm:$0xff] }
  0x2d   : > { %686 = vmatpush.msra.mxu1 %v2489_v6  ;;  %v704_v24 = vmul.f32 32.0, %v2185_v23  ;;  %vm708_vm3 = vweird.f32 %v2185_v23 }
  0x2e   : > { %v739_v34 = vld [vmem:[%s3103_s0 + $0x10] sm:$0xff]  ;;  %v740_v35 = vld [vmem:[%s3103_s0 + $0x18] sm:$0xff]  ;;  %v737_v43 = vld [vmem:[%s3103_s0] sm:$0xff]  ;;  %781 = vmatpush.bf16.msra.mxu2 %v768_v50 }
  0x2f   : > { %687 = vmatpush.msra.mxu1 %v2494_v7  ;;  %v705_v25 = vsub.f32 1.0, %v704_v24  ;;  %v743_v37 = vpack.c.bf16 %v740_v35, %v739_v34  ;;  %v738_v44 = vld [vmem:[%s3103_s0 + $0x8] sm:$0xff]  ;;  %804 = vmatpush.bf16.msra.mxu3 %v791_v51  ;;  %v2164_v24 = vld [vmem:[%s3110_s8] ss:$0 sm:$0xff]  ;;  %v695_v34 = vshrl.u32 %v654_v13, 7 }
  0x30   : > { %v742_v46 = vpack.c.bf16 %v738_v44, %v737_v43  ;;  %v810_v44 = vld [vmem:[%s3049_s11] sm:$0xff] }
  0x31   : > { %688 = vmatpush.msra.mxu1 %v662_v11  ;;  %v706_v26 = vmul.f32 %v2185_v23, %v705_v25  ;;  %vm2595_vm9 = vcmp.le.s32.totalorder %v2516_v14, %v695_v34  ;;  %v872_v45 = vpack.c.bf16 %v810_v44, %v810_v44 }
  0x33   : > { %689 = vmatpush.msra.mxu1 %v661_v12  ;;  %v707_v27 = vadd.f32 %v2185_v23, %v706_v26 }
  0x35   : > { %v2527_v28 = vsel %vm708_vm3, %v2185_v23, %v707_v27  ;;  %757 = vmatpush.bf16.msrb.mxu1 %v743_v37 }
  0x39   : > { %758 = vmatpush.bf16.msrb.mxu1 %v742_v46  ;;  %v959_v46 = vsel %vm854_vm8, %v872_v45, 0 }
  0x9b   : > { %v658_v15 = vpop.permute.xlu0 %657 }
  0x9c   : > { %vm659_vm1 = vcmp.eq.s32.totalorder %v2516_v14, %v658_v15 }
  0x9d   : > { %v660_v17 = vsel %vm659_vm1, 1.0, %v2299_v16  ;;  %v2165_v16 = vld [vmem:[%s3047_s9] ss:$0 sm:$0xff] }
  0x9e   : > { %2030 = vmatmul.msk.f32.vlgmr.msra.gmra.mxu1 %vm670_vm0, %v660_v17  ;;  %v2166_v17 = vld [vmem:[%s3048_s10] ss:$0 sm:$0xff] }
 0x11b   : > { %v691_v19 = vpop.f32.mrf.mxu1 }
 0x11c   : > { %v2523_v20 = vadd.f32 %v691_v19, %v669_v18 }
 0x11e   : > { %v700_v21 = vsel %vm699_vm2, %v2523_v20, 0.0 }
 0x11f   : > { %701 = vadd.xlane.f32.xlu0 %v700_v21 }
 0x192   : > { %v702_v29 = vpop.xlane.xlu0 %701 }
 0x193   : > { %v710_v30 = vmul.f32 %v2527_v28, %v702_v29 }
 0x195   : > { %v711_v31 = vsub.f32 %v2523_v20, %v710_v30 }
 0x197   : > { %v712_v32 = vmul.f32 %v711_v31, %v711_v31 }
 0x199   : > { %v713_v33 = vsel %vm699_vm2, %v712_v32, 0.0 }
 0x19a   : > { %714 = vadd.xlane.f32.xlu1 %v713_v33 }
 0x20d   : > { %v715_v52 = vpop.xlane.xlu1 %714 }
 0x20e   : > { %v716_v53 = vmul.f32 %v715_v52, %v2527_v28 }
 0x210   : > { %v717_v54 = vadd.f32 1e-05, %v716_v53 }
 0x212   : > { %2186 = vrsqrt.f32 %v717_v54  ;;  %vm724_vm5 = vweird.f32 %v717_v54 }
 0x218   : > { %v2187_v55 = vpop.eup %2186 }
 0x219   : > { %v719_v56 = vmul.f32 %v2187_v55, %v717_v54  ;;  %vm725_vm4 = vweird.f32 %v2187_v55 }
 0x21a   : > { %vm726_vm6 = vmor %vm724_vm5, %vm725_vm4 }
 0x21b   : > { %v720_v57 = vmul.f32 %v2187_v55, %v719_v56 }
 0x21d   : > { %v721_v58 = vmul.f32 0.5, %v720_v57 }
 0x21f   : > { %v722_v59 = vsub.f32 1.5, %v721_v58 }
 0x221   : > { %v723_v60 = vmul.f32 %v2187_v55, %v722_v59 }
 0x223   : > { %v727_v62 = vsel %vm726_vm6, %v2187_v55, %v723_v60 }
 0x224   : > { %v728_v63 = vmul.f32 %v727_v62, %v711_v31 }
 0x226   : > { %v732_v10 = vmul.f32 %v2162_v61, %v728_v63 }
 0x228   : > { %v736_v11 = vadd.f32 %v2163_v3, %v732_v10 }
 0x22a   : > { %v741_v12 = vpack.c.bf16 %v736_v11, %v736_v11 }
 0x22c   : > { %2031 = vmatmul.msk.bf16.vlgmr.msrb.gmra.mxu1 %vm699_vm2, %v741_v12  ;;  %2032 = vmatmul.msk.bf16.vlgmr.msra.gmra.mxu2 %vm699_vm2, %v741_v12 }
 0x22d   : > { %2033 = vmatmul.msk.bf16.vlgmr.msra.gmra.mxu3 %vm699_vm2, %v741_v12 }
 0x2a9   : > { %v760_v15 = vpop.f32.mrf.mxu1 }
 0x2aa   : > { %v761_v30 = vadd.f32 %v2164_v24, %v760_v15 }
 0x2ac   : > { %v814_v33 = vpack.c.bf16 %v761_v30, %v761_v30 }
 0x2af   : > { %v783_v18 = vpop.f32.mrf.mxu2 }
 0x2b0   : > { %v784_v19 = vadd.f32 %v2165_v16, %v783_v18  ;;  %v806_v21 = vpop.f32.mrf.mxu3 }
 0x2b1   : > { %v807_v22 = vadd.f32 %v2166_v17, %v806_v21  ;;  %v762_v23 = vpop.f32.mrf.mxu1 }
 0x2b2   : > { %v815_v25 = vpack.c.bf16 %v784_v19, %v784_v19 }
 0x2b3   : > { %v2587_v26 = vpack.c.bf16 %v807_v22, %v807_v22 }
 0x2b4   : > { %v821_v27 = vsel %vm816_vm7, %v815_v25, 0 }
 0x2b5   : > { %830 = vmatpush.bf16.xpose.msra.mxu0 %v821_v27  ;;  %v856_v29 = vsel %vm854_vm8, %v2587_v26, 0 }
 0x2b6   : > { %865 = vmatpush.bf16.msra.mxu1 %v856_v29 }
 0x2b7   : > { %v785_v31 = vpop.f32.mrf.mxu2 }
 0x2b8   : > { %v808_v32 = vpop.f32.mrf.mxu3 }
 0x2ba   : > { %968 = vmatpush.bf16.msrb.mxu1 %v959_v46 }
 0x2bc   : > { %2034 = vmatmul.msk.bf16.vlgmr.msra.gmra.mxu0 %vm816_vm7, %v814_v33 }
 0x339   : > { %v832_v36 = vpop.f32.mrf.mxu0 }
 0x33a   : > { %v836_v37 = vmul.f32 0.35355338, %v832_v36 }
 0x33c   : > { %v837_v38 = vsel %vm2595_vm9, %v836_v37, -1e+30 }
 0x33d   : > { %v838_v39 = vsel %vm816_vm7, %v837_v38, -inf }
 0x33e   : > { %839 = vmax.xlane.f32.xlu1 %v838_v39 }
 0x341   : > { %v834_v40 = vpop.f32.mrf.mxu0 }
 0x357   : > { %874 = vrot.lane.b32.xlu1 %v814_v33, %s3073_s23 }
 0x35f   : > { %974 = vrot.lane.b32.xlu1 %v814_v33, %s3075_s2 }
 0x3b1   : > { %v840_v13 = vpop.xlane.xlu1 %839 }
 0x3b2   : > { %v841_v14 = vsub.f32 %v837_v38, %v840_v13 }
 0x3b4   : > { %v842_v41 = vmul.f32 1.442695, %v841_v14 }
 0x3b6   : > { %2188 = vpow2.f32 %v842_v41 }
 0x3bc   : > { %v2189_v42 = vpop.eup %2188 }
 0x3bd   : > { %v844_v43 = vsel %vm816_vm7, %v2189_v42, 0.0 }
 0x3be   : > { %845 = vadd.xlane.f32.xlu2 %v844_v43 }
 0x3c9   : > { %v875_v53 = vpop.permute.xlu1 %874 }
 0x3d1   : > { %v975_v58 = vpop.permute.xlu1 %974 }
 0x3d6   : > { %877 = vrot.lane.b32.xlu2 %v815_v25, %s3073_s23 }
 0x3de   : > { %976 = vrot.lane.b32.xlu2 %v815_v25, %s3075_s2 }
 0x3e6   : > { %1056 = vrot.lane.b32.xlu2 %v815_v25, %s3071_s27 }
 0x3ee   : > { %1054 = vrot.lane.b32.xlu2 %v814_v33, %s3071_s27 }
 0x431   : > { %v846_v47 = vpop.xlane.xlu2 %845 }
 0x432   : > { %2190 = vrcp.f32 %v846_v47 }
 0x438   : > { %v2191_v48 = vpop.eup %2190 }
 0x439   : > { %v848_v49 = vmul.f32 %v2191_v48, %v2189_v42  ;;  %v878_v50 = vpop.permute.xlu2 %877 }
 0x43a   : > { %v883_v51 = vsel %vm816_vm7, %v878_v50, 0 }
 0x43b   : > { %v849_v52 = vpack.c.bf16 %v848_v49, %v848_v49  ;;  %892 = vmatpush.bf16.xpose.msrb.mxu2 %v883_v51 }
 0x43d   : > { %2035 = vmatmul.msk.bf16.vlgmr.msra.gmra.mxu1 %vm816_vm7, %v849_v52 }
 0x441   : > { %v977_v54 = vpop.permute.xlu2 %976 }
 0x442   : > { %v982_v55 = vsel %vm816_vm7, %v977_v54, 0  ;;  %2036 = vmatmul.msk.bf16.vlgmr.msrb.gmra.mxu2 %vm816_vm7, %v875_v53 }
 0x443   : > { %991 = vmatpush.bf16.xpose.msra.mxu2 %v982_v55 }
 0x449   : > { %v1057_v56 = vpop.permute.xlu2 %1056 }
 0x44a   : > { %v1062_v57 = vsel %vm816_vm7, %v1057_v56, 0 }
 0x44b   : > { %1071 = vmatpush.bf16.xpose.msra.mxu1 %v1062_v57  ;;  %v811_v57 = vld [vmem:[%s3049_s11 + $0x8] sm:$0xff] }
 0x451   : > { %v1055_v11 = vpop.permute.xlu2 %1054 }
 0x452   : > { %2040 = vmatmul.msk.bf16.vlgmr.msra.gmra.mxu2 %vm816_vm7, %v975_v58  ;;  %v935_v58 = vpack.c.bf16 %v811_v57, %v811_v57 }
 0x4ba   : > { %v867_v59 = vpop.f32.mrf.mxu1 }
 0x4bb   : > { %v871_v60 = vpack.c.bf16 %v867_v59, %v867_v59  ;;  %v940_v59 = vsel %vm854_vm8, %v935_v58, 0 }
 0x4bc   : > { %949 = vmatpush.bf16.msrb.mxu0 %v940_v59  ;;  %v2168_v59 = vld [vmem:[%s3051_s13] ss:$0 sm:$0xff] }
 0x4bd   : > { %2039 = vmatmul.msk.bf16.vlgmr.msrb.gmra.mxu1 %vm816_vm7, %v871_v60 }
 0x4c2   : > { %v869_v61 = vpop.f32.mrf.mxu1 }
 0x4c5   : > { %v894_v62 = vpop.f32.mrf.mxu2 }
 0x4c6   : > { %v898_v63 = vmul.f32 0.35355338, %v894_v62 }
 0x4c8   : > { %v899_v3 = vsel %vm2595_vm9, %v898_v63, -1e+30  ;;  %v812_v63 = vld [vmem:[%s3049_s11 + $0x10] sm:$0xff] }
 0x4c9   : > { %v900_v10 = vsel %vm816_vm7, %v899_v3, -inf }
 0x4ca   : > { %901 = vmax.xlane.f32.xlu1 %v900_v10 }
 0x4cd   : > { %v896_v12 = vpop.f32.mrf.mxu2  ;;  %2043 = vmatmul.msk.bf16.vlgmr.msra.gmra.mxu1 %vm816_vm7, %v1055_v11 }
 0x4d5   : > { %v993_v15 = vpop.f32.mrf.mxu2 }
 0x4d6   : > { %v997_v16 = vmul.f32 0.35355338, %v993_v15 }
 0x4d8   : > { %v998_v17 = vsel %vm2595_vm9, %v997_v16, -1e+30 }
 0x4d9   : > { %v999_v18 = vsel %vm816_vm7, %v998_v17, -inf }
 0x4da   : > { %1000 = vmax.xlane.f32.xlu2 %v999_v18 }
 0x4dd   : > { %v995_v19 = vpop.f32.mrf.mxu2 }
 0x4f2   : > { %1091 = vrot.lane.b32.xlu2 %v2587_v26, %s3071_s27  ;;  %s3115_s27 = smov 104  }
 0x53a   : > { %v2629_v21 = vpop.f32.mrf.mxu1 }
 0x53d   : > { %v902_v22 = vpop.xlane.xlu1 %901 }
 0x53e   : > { %v903_v23 = vsub.f32 %v899_v3, %v902_v22  ;;  %v1033_v3 = vpack.c.bf16 %v812_v63, %v812_v63  ;;  %v813_v22 = vld [vmem:[%s3049_s11 + $0x18] sm:$0xff] }
 0x540   : > { %v904_v24 = vmul.f32 1.442695, %v903_v23  ;;  %v1038_v11 = vsel %vm854_vm8, %v1033_v3, 0  ;;  %v1113_v23 = vpack.c.bf16 %v813_v22, %v813_v22  ;;  %v1253_v22 = vld [vmem:[%s3055_s17 + $0x50] sm:$0xff] }
 0x541   : > { %1047 = vmatpush.bf16.msra.mxu0 %v1038_v11  ;;  %v1257_v11 = vld [vmem:[%s3055_s17 + $0x70] sm:$0xff] }
 0x542   : > { %2192 = vpow2.f32 %v904_v24  ;;  %v972_v25 = vpop.f32.mrf.mxu1  ;;  %v1118_v24 = vsel %vm854_vm8, %v1113_v23, 0  ;;  %v1254_v23 = vld [vmem:[%s3055_s17 + $0x58] sm:$0xff] }
 0x548   : > { %v2193_v27 = vpop.eup %2192 }
 0x549   : > { %v906_v29 = vsel %vm816_vm7, %v2193_v27, 0.0 }
 0x54a   : > { %v1073_v30 = vpop.f32.mrf.mxu1  ;;  %907 = vadd.xlane.f32.xlu0 %v906_v29 }
 0x54b   : > { %v1077_v31 = vmul.f32 0.35355338, %v1073_v30 }
 0x54d   : > { %v1001_v32 = vpop.xlane.xlu2 %1000  ;;  %v1078_v34 = vsel %vm2595_vm9, %v1077_v31, -1e+30 }
 0x54e   : > { %v1002_v33 = vsub.f32 %v998_v17, %v1001_v32  ;;  %v1079_v37 = vsel %vm816_vm7, %v1078_v34, -inf }
 0x550   : > { %v1003_v36 = vmul.f32 1.442695, %v1002_v33 }
 0x552   : > { %2194 = vpow2.f32 %v1003_v36  ;;  %v1075_v38 = vpop.f32.mrf.mxu1  ;;  %1080 = vmax.xlane.f32.xlu0 %v1079_v37 }
 0x555   : > { %v1092_v39 = vpop.permute.xlu2 %1091 }
 0x556   : > { %v1097_v40 = vsel %vm854_vm8, %v1092_v39, 0  ;;  %v2167_v39 = vld [vmem:[%s3050_s12] ss:$0 sm:$0xff] }
 0x557   : > { %1106 = vmatpush.bf16.msrb.mxu2 %v1097_v40 }
 0x558   : > { %v2195_v13 = vpop.eup %2194 }
 0x559   : > { %v1005_v14 = vsel %vm816_vm7, %v2195_v13, 0.0 }
 0x55a   : > { %1006 = vadd.xlane.f32.xlu1 %v1005_v14 }
 0x566   : > { %913 = vrot.lane.b32.xlu0 %v2587_v26, %s3073_s23  ;;  %s3114_s23 = smov 120  }
 0x573   : > { %1011 = vrot.lane.b32.xlu1 %v2587_v26, %s3075_s2  ;;  %s3113_s2 = smov 112  }
 0x5bd   : > { %v908_v41 = vpop.xlane.xlu0 %907 }
 0x5c5   : > { %v1081_v42 = vpop.xlane.xlu0 %1080 }
 0x5c6   : > { %v1082_v43 = vsub.f32 %v1078_v34, %v1081_v42 }
 0x5c8   : > { %v1083_v44 = vmul.f32 1.442695, %v1082_v43 }
 0x5ca   : > { %2196 = vpow2.f32 %v1083_v44 }
 0x5cb   : > { %2198 = vrcp.f32 %v908_v41 }
 0x5cd   : > { %v1007_v51 = vpop.xlane.xlu1 %1006 }
 0x5ce   : > { %2200 = vrcp.f32 %v1007_v51 }
 0x5d0   : > { %v2197_v45 = vpop.eup %2196 }
 0x5d1   : > { %v1085_v46 = vsel %vm816_vm7, %v2197_v45, 0.0  ;;  %v2199_v47 = vpop.eup %2198 }
 0x5d2   : > { %1086 = vadd.xlane.f32.xlu0 %v1085_v46  ;;  %v910_v48 = vmul.f32 %v2199_v47, %v2193_v27  ;;  %v1175_v46 = vld [vmem:[%s3053_s15 + $0x18] sm:$0xff] }
 0x5d4   : > { %v911_v52 = vpack.c.bf16 %v910_v48, %v910_v48  ;;  %v2201_v26 = vpop.eup %2200  ;;  %v1172_v48 = vld [vmem:[%s3053_s15] sm:$0xff] }
 0x5d5   : > { %v1009_v55 = vmul.f32 %v2201_v26, %v2195_v13 }
 0x5d7   : > { %v1010_v56 = vpack.c.bf16 %v1009_v55, %v1009_v55 }
 0x5d8   : > { %v914_v49 = vpop.permute.xlu0 %913 }
 0x5d9   : > { %v919_v50 = vsel %vm854_vm8, %v914_v49, 0  ;;  %v1173_v49 = vld [vmem:[%s3053_s15 + $0x8] sm:$0xff] }
 0x5da   : > { %928 = vmatpush.bf16.msrb.mxu3 %v919_v50  ;;  %v1177_v50 = vpack.c.bf16 %v1173_v49, %v1172_v48  ;;  %v1246_v48 = vld [vmem:[%s3055_s17 + $0x18] sm:$0xff] }
 0x5dd   : > { %2037 = vmatmul.msk.bf16.vlgmr.msrb.gmra.mxu3 %vm816_vm7, %v911_v52 }
 0x5e5   : > { %v1012_v53 = vpop.permute.xlu1 %1011 }
 0x5e6   : > { %v1017_v54 = vsel %vm854_vm8, %v1012_v53, 0 }
 0x5e7   : > { %1026 = vmatpush.bf16.msra.mxu3 %v1017_v54 }
 0x5eb   : > { %1127 = vmatpush.bf16.msrb.mxu3 %v1118_v24 }
 0x5ed   : > { %2041 = vmatmul.msk.bf16.vlgmr.msra.gmra.mxu3 %vm816_vm7, %v1010_v56 }
 0x645   : > { %v1087_v60 = vpop.xlane.xlu0 %1086 }
 0x646   : > { %2202 = vrcp.f32 %v1087_v60 }
 0x64c   : > { %v2203_v61 = vpop.eup %2202 }
 0x64d   : > { %v1089_v62 = vmul.f32 %v2203_v61, %v2197_v45 }
 0x64f   : > { %v1090_v10 = vpack.c.bf16 %v1089_v62, %v1089_v62  ;;  %v2169_v62 = vld [vmem:[%s3052_s14] ss:$0 sm:$0xff] }
 0x651   : > { %2044 = vmatmul.msk.bf16.vlgmr.msrb.gmra.mxu2 %vm816_vm7, %v1090_v10 }
 0x660   : > { %v930_v12 = vpop.f32.mrf.mxu3 }
 0x661   : > { %v934_v15 = vpack.c.bf16 %v930_v12, %v930_v12  ;;  %v1258_v12 = vld [vmem:[%s3055_s17 + $0x78] sm:$0xff] }
 0x663   : > { %2038 = vmatmul.msk.bf16.vlgmr.msrb.gmra.mxu0 %vm816_vm7, %v934_v15  ;;  %v1267_v15 = vpack.c.bf16 %v1258_v12, %v1257_v11 }
 0x665   : > { %1268 = vmatpush.bf16.msrb.mxu1 %v1267_v15 }
 0x668   : > { %v932_v16 = vpop.f32.mrf.mxu3 }
 0x669   : > { %v1255_v16 = vld [vmem:[%s3055_s17 + $0x60] sm:$0xff] }
 0x670   : > { %v1028_v17 = vpop.f32.mrf.mxu3 }
 0x671   : > { %v1032_v18 = vpack.c.bf16 %v1028_v17, %v1028_v17  ;;  %v1256_v17 = vld [vmem:[%s3055_s17 + $0x68] sm:$0xff] }
 0x673   : > { %2042 = vmatmul.msk.bf16.vlgmr.msra.gmra.mxu0 %vm816_vm7, %v1032_v18  ;;  %v1266_v18 = vpack.c.bf16 %v1256_v17, %v1255_v16 }
 0x675   : > { %1269 = vmatpush.bf16.msrb.mxu1 %v1266_v18 }
 0x678   : > { %v1030_v19 = vpop.f32.mrf.mxu3 }
 0x679   : > { %v2170_v19 = vld [vmem:[%s3054_s16] ss:$0 sm:$0xff] }
 0x6d4   : > { %v1108_v25 = vpop.f32.mrf.mxu2 }
 0x6d5   : > { %v1112_v27 = vpack.c.bf16 %v1108_v25, %v1108_v25  ;;  %v1265_v25 = vpack.c.bf16 %v1254_v23, %v1253_v22 }
 0x6d7   : > { %2045 = vmatmul.msk.bf16.vlgmr.msrb.gmra.mxu3 %vm816_vm7, %v1112_v27  ;;  %1270 = vmatpush.bf16.msrb.mxu1 %v1265_v25 }
 0x6dc   : > { %v1110_v29 = vpop.f32.mrf.mxu2 }
 0x6e0   : > { %v951_v30 = vpop.f32.mrf.mxu0 }
 0x6e1   : > { %v971_v32 = vadd.f32 %v2629_v21, %v951_v30  ;;  %v1251_v30 = vld [vmem:[%s3055_s17 + $0x40] sm:$0xff] }
 0x6e8   : > { %v953_v31 = vpop.f32.mrf.mxu0 }
 0x6e9   : > { %v1252_v31 = vld [vmem:[%s3055_s17 + $0x48] sm:$0xff] }
 0x6f0   : > { %v1049_v33 = vpop.f32.mrf.mxu0 }
 0x6f1   : > { %v1053_v34 = vadd.f32 %v1049_v33, %v971_v32  ;;  %v1264_v32 = vpack.c.bf16 %v1252_v31, %v1251_v30 }
 0x6f3   : > { %1271 = vmatpush.bf16.msrb.mxu1 %v1264_v32 }
 0x6f8   : > { %v1051_v36 = vpop.f32.mrf.mxu0 }
 0x6f9   : > { %v1249_v36 = vld [vmem:[%s3055_s17 + $0x30] sm:$0xff] }
 0x75a   : > { %v1129_v37 = vpop.f32.mrf.mxu3 }
 0x75b   : > { %v1133_v38 = vadd.f32 %v1129_v37, %v1053_v34  ;;  %v1250_v37 = vld [vmem:[%s3055_s17 + $0x38] sm:$0xff] }
 0x75d   : > { %v1134_v40 = vadd.f32 %v1133_v38, %v2523_v20  ;;  %v1174_v20 = vld [vmem:[%s3053_s15 + $0x10] sm:$0xff] }
 0x75e   : > { %v1178_v47 = vpack.c.bf16 %v1175_v46, %v1174_v20 }
 0x75f   : > { %v2667_v13 = vadd.f32 %v2167_v39, %v1134_v40  ;;  %v1263_v39 = vpack.c.bf16 %v1250_v37, %v1249_v36  ;;  %v2171_v36 = vld [vmem:[%s3056_s18] ss:$0 sm:$0xff] }
 0x760   : > { %1192 = vmatpush.bf16.msrb.mxu0 %v1178_v47  ;;  %v1245_v47 = vld [vmem:[%s3055_s17 + $0x10] sm:$0xff] }
 0x761   : > { %v1142_v14 = vsel %vm699_vm2, %v2667_v13, 0.0  ;;  %1272 = vmatpush.bf16.msrb.mxu1 %v1263_v39 }
 0x762   : > { %v1131_v41 = vpop.f32.mrf.mxu3  ;;  %1143 = vadd.xlane.f32.xlu2 %v1142_v14 }
 0x764   : > { %1193 = vmatpush.bf16.msrb.mxu0 %v1177_v50  ;;  %v1261_v50 = vpack.c.bf16 %v1246_v48, %v1245_v47  ;;  %v2065_v47 = vld [vmem:[%s3105_s7 + $0x38] sm:$0xff] }
 0x7d5   : > { %v1144_v42 = vpop.xlane.xlu2 %1143 }
 0x7d6   : > { %v1145_v21 = vmul.f32 %v1144_v42, %v2527_v28 }
 0x7d8   : > { %v1146_v43 = vsub.f32 %v2667_v13, %v1145_v21  ;;  %v1247_v21 = vld [vmem:[%s3055_s17 + $0x20] sm:$0xff] }
 0x7da   : > { %v1147_v44 = vmul.f32 %v1146_v43, %v1146_v43 }
 0x7dc   : > { %v1148_v45 = vsel %vm699_vm2, %v1147_v44, 0.0 }
 0x7dd   : > { %1149 = vadd.xlane.f32.xlu1 %v1148_v45 }
 0x850   : > { %v1150_v51 = vpop.xlane.xlu1 %1149 }
 0x851   : > { %v1151_v52 = vmul.f32 %v1150_v51, %v2527_v28 }
 0x853   : > { %v1152_v26 = vadd.f32 1e-05, %v1151_v52 }
 0x855   : > { %2204 = vrsqrt.f32 %v1152_v26  ;;  %vm1159_vm11 = vweird.f32 %v1152_v26 }
 0x85b   : > { %v2205_v53 = vpop.eup %2204 }
 0x85c   : > { %v1154_v54 = vmul.f32 %v2205_v53, %v1152_v26  ;;  %vm1160_vm10 = vweird.f32 %v2205_v53  ;;  %v1243_v26 = vld [vmem:[%s3055_s17] sm:$0xff] }
 0x85d   : > { %vm1161_vm12 = vmor %vm1159_vm11, %vm1160_vm10 }
 0x85e   : > { %v1155_v55 = vmul.f32 %v2205_v53, %v1154_v54 }
 0x860   : > { %v1156_v56 = vmul.f32 0.5, %v1155_v55 }
 0x862   : > { %v1157_v57 = vsub.f32 1.5, %v1156_v56 }
 0x864   : > { %v1158_v58 = vmul.f32 %v2205_v53, %v1157_v57 }
 0x866   : > { %v1162_v60 = vsel %vm1161_vm12, %v2205_v53, %v1158_v58  ;;  %v1244_v53 = vld [vmem:[%s3055_s17 + $0x8] sm:$0xff] }
 0x867   : > { %v1163_v61 = vmul.f32 %v1162_v60, %v1146_v43  ;;  %v1248_v43 = vld [vmem:[%s3055_s17 + $0x28] sm:$0xff]  ;;  %v1260_v55 = vpack.c.bf16 %v1244_v53, %v1243_v26 }
 0x868   : > { %v1262_v44 = vpack.c.bf16 %v1248_v43, %v1247_v21  ;;  %v2053_v43 = vld [vmem:[%s3103_s0 + $0x38] sm:$0xff]  ;;  %v2057_v53 = vld [vmem:[%s3104_s6 + $0x28] sm:$0xff] }
 0x869   : > { %v1167_v63 = vmul.f32 %v2168_v59, %v1163_v61 }
 0x86a   : > { %1273 = vmatpush.bf16.msrb.mxu1 %v1262_v44  ;;  %v2058_v44 = vld [vmem:[%s3104_s6 + $0x30] sm:$0xff] }
 0x86b   : > { %v1171_v3 = vadd.f32 %v2169_v62, %v1167_v63 }
 0x86d   : > { %v1176_v10 = vpack.c.bf16 %v1171_v3, %v1171_v3 }
 0x86e   : > { %1274 = vmatpush.bf16.msrb.mxu1 %v1261_v50  ;;  %v2050_v50 = vld [vmem:[%s3103_s0 + $0x20] sm:$0xff] }
 0x86f   : > { %2046 = vmatmul.msk.bf16.vlgmr.msrb.gmra.mxu0 %vm699_vm2, %v1176_v10 }
 0x872   : > { %1275 = vmatpush.bf16.msrb.mxu1 %v1260_v55  ;;  %v2063_v55 = vld [vmem:[%s3105_s7 + $0x28] sm:$0xff] }
 0x8ec   : > { %v1195_v24 = vpop.f32.mrf.mxu0 }
 0x8ed   : > { %v2715_v27 = vadd.f32 %v2170_v19, %v1195_v24 }
 0x8ef   : > { %v1200_v29 = vmul.f32 0.70710677, %v2715_v27  ;;  %v1199_v31 = vmul.f32 0.5, %v2715_v27 }
 0x8f1   : > { %v1201_v33 = vmul.f32 %v1200_v29, %v1200_v29 }
 0x8f3   : > { %v1202_v34 = vmin.f32 %v1201_v33, 16.0 }
 0x8f4   : > { %v1197_v38 = vpop.f32.mrf.mxu0 }
 0x8f5   : > { %v1203_v40 = vmul.f32 2.1237322e-06, %v1202_v34  ;;  %v1214_v14 = vmul.f32 3.8918573e-05, %v1202_v34 }
 0x8f7   : > { %v1204_v41 = vadd.f32 0.00028619796, %v1203_v40  ;;  %v1215_v42 = vadd.f32 0.001143296, %v1214_v14 }
 0x8f9   : > { %v1205_v45 = vmul.f32 %v1204_v41, %v1202_v34  ;;  %v1216_v20 = vmul.f32 %v1215_v42, %v1202_v34 }
 0x8fb   : > { %v1217_v46 = vadd.f32 0.014752088, %v1216_v20  ;;  %v1206_v49 = vadd.f32 0.0036580483, %v1205_v45  ;;  %v2059_v20 = vld [vmem:[%s3104_s6 + $0x38] sm:$0xff] }
 0x8fc   : > { %v1356_v48 = vpack.c.bf16 %v2059_v20, %v2058_v44 }
 0x8fd   : > { %v1218_v51 = vmul.f32 %v1217_v46, %v1202_v34  ;;  %v1207_v54 = vmul.f32 %v1206_v49, %v1202_v34  ;;  %v2064_v46 = vld [vmem:[%s3105_s7 + $0x30] sm:$0xff] }
 0x8fe   : > { %v1381_v49 = vpack.c.bf16 %v2065_v47, %v2064_v46  ;;  %1368 = vmatpush.bf16.msra.mxu3 %v1356_v48 }
 0x8ff   : > { %v1219_v52 = vadd.f32 0.112945676, %v1218_v51  ;;  %v1208_v58 = vadd.f32 0.05243302, %v1207_v54  ;;  %v2051_v51 = vld [vmem:[%s3103_s0 + $0x28] sm:$0xff]  ;;  %v2062_v54 = vld [vmem:[%s3105_s7 + $0x20] sm:$0xff] }
 0x900   : > { %1393 = vmatpush.bf16.msra.mxu0 %v1381_v49  ;;  %v1327_v26 = vpack.c.bf16 %v2051_v51, %v2050_v50  ;;  %v2068_v50 = vld [vmem:[%s3049_s11 + $0x20] sm:$0xff] }
 0x901   : > { %v1220_v56 = vmul.f32 %v1219_v52, %v1202_v34  ;;  %v1209_v61 = vmul.f32 %v1208_v58, %v1202_v34  ;;  %v2056_v52 = vld [vmem:[%s3104_s6 + $0x20] sm:$0xff]  ;;  %v1461_v51 = vpack.c.bf16 %v2068_v50, %v2068_v50 }
 0x903   : > { %v1221_v57 = vadd.f32 0.4994258, %v1220_v56  ;;  %v1210_v62 = vadd.f32 0.18741608, %v1209_v61  ;;  %v1355_v56 = vpack.c.bf16 %v2057_v53, %v2056_v52  ;;  %v1548_v52 = vsel %vm854_vm8, %v1461_v51, 0 }
 0x905   : > { %v1222_v59 = vmul.f32 %v1221_v57, %v1202_v34  ;;  %v1211_v3 = vmul.f32 %v1210_v62, %v1202_v34  ;;  %v1380_v57 = vpack.c.bf16 %v2063_v55, %v2062_v54  ;;  %1369 = vmatpush.bf16.msra.mxu3 %v1355_v56 }
 0x907   : > { %v1223_v60 = vadd.f32 1.0, %v1222_v59  ;;  %v1212_v15 = vadd.f32 1.1283791, %v1211_v3  ;;  %1394 = vmatpush.bf16.msra.mxu0 %v1380_v57 }
 0x909   : > { %2206 = vrcp.f32 %v1223_v60  ;;  %v1235_v12 = vand.u32 2147483648, %v1223_v60  ;;  %v1233_v17 = vand.u32 2147483647, %v1223_v60  ;;  %vm1229_vm14 = vweird.f32 %v1223_v60 }
 0x90a   : > { %v1213_v22 = vmul.f32 %v1212_v15, %v1200_v29 }
 0x90b   : > { %v1236_v19 = vor.u32 1.1754944e-38, %v1235_v12  ;;  %vm1234_vm1 = vcmp.eq.f32.partialorder %v1233_v17, 8.507059e+37  ;;  %v2172_v12 = vld [vmem:[%s3107_s29 + $0x1] ss:$0 sm:$0xff] }
 0x90c   : > { %v2173_v17 = vld [vmem:[%s3109_s21 + $0x1] ss:$0 sm:$0xff] }
 0x90f   : > { %v2207_v63 = vpop.eup %2206 }
 0x910   : > { %v1225_v10 = vmul.f32 %v2207_v63, %v1223_v60  ;;  %vm1230_vm13 = vweird.f32 %v2207_v63 }
 0x911   : > { %vm1231_vm15 = vmor %vm1229_vm14, %vm1230_vm13 }
 0x912   : > { %v1226_v11 = vsub.f32 1.0, %v1225_v10 }
 0x914   : > { %v1227_v16 = vmul.f32 %v2207_v63, %v1226_v11 }
 0x916   : > { %v1228_v18 = vadd.f32 %v2207_v63, %v1227_v16 }
 0x918   : > { %v1232_v23 = vsel %vm1231_vm15, %v2207_v63, %v1228_v18 }
 0x919   : > { %v1237_v24 = vsel %vm1234_vm1, %v1236_v19, %v1232_v23  ;;  %v2174_v23 = vld [vmem:[%s3048_s10 + $0x1] ss:$0 sm:$0xff] }
 0x91a   : > { %v1238_v25 = vmul.f32 %v1237_v24, %v1213_v22 }
 0x91c   : > { %v2047_v30 = vclamps-f32 %v1238_v25, 1.0 }
 0x91e   : > { %v1241_v32 = vadd.f32 1.0, %v2047_v30  ;;  %v2175_v30 = vld [vmem:[%s3110_s8 + $0x1] ss:$0 sm:$0xff] }
 0x920   : > { %v1242_v33 = vmul.f32 %v1241_v32, %v1199_v31  ;;  %v2176_v31 = vld [vmem:[%s3047_s9 + $0x1] ss:$0 sm:$0xff] }
 0x922   : > { %v1259_v34 = vpack.c.bf16 %v1242_v33, %v1242_v33 }
 0x924   : > { %1276 = vmatmul.bf16.vlgmr.msrb.gmra.mxu1 %v1259_v34 }
 0x9a1   : > { %v1277_v37 = vpop.f32.mrf.mxu1 }
 0x9a2   : > { %v1281_v38 = vadd.f32 %v1277_v37, %v2667_v13  ;;  %v2052_v13 = vld [vmem:[%s3103_s0 + $0x30] sm:$0xff]  ;;  %s647_s0 = scalar_lea.vmem [#allocation2], %s2028_s30 }
 0x9a3   : > { %v1328_v45 = vpack.c.bf16 %v2053_v43, %v2052_v13  ;;  %s1962_s6 = sshll.u32 %s647_s0, 4  ;;  %s1963_s6 = int_to_ptr.vmem [resolvable:$true] %s1962_s6 }
 0x9a4   : > { %v2753_v39 = vadd.f32 %v2171_v36, %v1281_v38 }
 0x9a5   : > { %1343 = vmatpush.bf16.msra.mxu2 %v1328_v45 }
 0x9a6   : > { %v1291_v29 = vsel %vm699_vm2, %v2753_v39, 0.0 }
 0x9a7   : > { %1292 = vadd.xlane.f32.xlu0 %v1291_v29 }
 0x9a9   : > { %v1279_v40 = vpop.f32.mrf.mxu1  ;;  %1344 = vmatpush.bf16.msra.mxu2 %v1327_v26 }
 0xa1a   : > { %v1293_v14 = vpop.xlane.xlu0 %1292 }
 0xa1b   : > { %v1294_v27 = vmul.f32 %v1293_v14, %v2527_v28 }
 0xa1d   : > { %v1295_v41 = vsub.f32 %v2753_v39, %v1294_v27 }
 0xa1f   : > { %v1296_v42 = vmul.f32 %v1295_v41, %v1295_v41 }
 0xa21   : > { %v1297_v21 = vsel %vm699_vm2, %v1296_v42, 0.0 }
 0xa22   : > { %1298 = vadd.xlane.f32.xlu0 %v1297_v21 }
 0xa95   : > { %v1299_v58 = vpop.xlane.xlu0 %1298 }
 0xa96   : > { %v1300_v59 = vmul.f32 %v1299_v58, %v2527_v28 }
 0xa98   : > { %v1301_v60 = vadd.f32 1e-05, %v1300_v59 }
 0xa9a   : > { %2208 = vrsqrt.f32 %v1301_v60  ;;  %vm1308_vm4 = vweird.f32 %v1301_v60 }
 0xaa0   : > { %v2209_v61 = vpop.eup %2208 }
 0xaa1   : > { %v1303_v62 = vmul.f32 %v2209_v61, %v1301_v60  ;;  %vm1309_vm3 = vweird.f32 %v2209_v61 }
 0xaa2   : > { %vm1310_vm5 = vmor %vm1308_vm4, %vm1309_vm3 }
 0xaa3   : > { %v1304_v63 = vmul.f32 %v2209_v61, %v1303_v62 }
 0xaa5   : > { %v1305_v3 = vmul.f32 0.5, %v1304_v63 }
 0xaa7   : > { %v1306_v10 = vsub.f32 1.5, %v1305_v3 }
 0xaa9   : > { %v1307_v11 = vmul.f32 %v2209_v61, %v1306_v10 }
 0xaab   : > { %v1311_v15 = vsel %vm1310_vm5, %v2209_v61, %v1307_v11 }
 0xaac   : > { %v1312_v16 = vmul.f32 %v1311_v15, %v1295_v41 }
 0xaae   : > { %v1316_v18 = vmul.f32 %v2172_v12, %v1312_v16 }
 0xab0   : > { %v1320_v19 = vadd.f32 %v2173_v17, %v1316_v18 }
 0xab2   : > { %v1326_v22 = vpack.c.bf16 %v1320_v19, %v1320_v19 }
 0xab4   : > { %2055 = vmatmul.msk.bf16.vlgmr.msra.gmra.mxu2 %vm699_vm2, %v1326_v22  ;;  %2061 = vmatmul.msk.bf16.vlgmr.msra.gmra.mxu3 %vm699_vm2, %v1326_v22 }
 0xab5   : > { %2067 = vmatmul.msk.bf16.vlgmr.msra.gmra.mxu0 %vm699_vm2, %v1326_v22 }
 0xb32   : > { %v1396_v24 = vpop.f32.mrf.mxu0 }
 0xb33   : > { %v1397_v25 = vadd.f32 %v2174_v23, %v1396_v24 }
 0xb35   : > { %v2815_v32 = vpack.c.bf16 %v1397_v25, %v1397_v25 }
 0xb37   : > { %v1346_v33 = vpop.f32.mrf.mxu2  ;;  %v1371_v34 = vpop.f32.mrf.mxu3  ;;  %v1445_v36 = vsel %vm854_vm8, %v2815_v32, 0 }
 0xb38   : > { %v1347_v37 = vadd.f32 %v2175_v30, %v1346_v33  ;;  %v1372_v38 = vadd.f32 %v2176_v31, %v1371_v34  ;;  %1454 = vmatpush.bf16.msrb.mxu3 %v1445_v36 }
 0xb3a   : > { %v1405_v29 = vpack.c.bf16 %v1347_v37, %v1347_v37  ;;  %v1406_v40 = vpack.c.bf16 %v1372_v38, %v1372_v38  ;;  %v1398_v14 = vpop.f32.mrf.mxu0 }
 0xb3c   : > { %1565 = vrot.lane.b32.xlu1 %v1406_v40, %s3113_s2  ;;  %1463 = vrot.lane.b32.xlu2 %v1405_v29, %s3114_s23  ;;  %v1411_v27 = vsel %vm816_vm7, %v1406_v40, 0 }
 0xb3d   : > { %1420 = vmatpush.bf16.xpose.msrb.mxu2 %v1411_v27  ;;  %1557 = vmatpush.bf16.msra.mxu3 %v1548_v52 }
 0xb3f   : > { %v1348_v41 = vpop.f32.mrf.mxu2  ;;  %v1373_v42 = vpop.f32.mrf.mxu3 }
 0xb44   : > { %1563 = vrot.lane.b32.xlu2 %v1405_v29, %s3113_s2  ;;  %2072 = vmatmul.msk.bf16.vlgmr.msrb.gmra.mxu2 %vm816_vm7, %v1405_v29 }
 0xb96   : > { %v1464_v60 = vpop.permute.xlu2 %1463 }
 0xb9e   : > { %v1564_v63 = vpop.permute.xlu2 %1563 }
 0xbae   : > { %v1566_v56 = vpop.permute.xlu1 %1565 }
 0xbaf   : > { %v1571_v59 = vsel %vm816_vm7, %v1566_v56, 0 }
 0xbc7   : > { %v1422_v21 = vpop.f32.mrf.mxu2 }
 0xbc8   : > { %v1426_v13 = vmul.f32 0.35355338, %v1422_v21 }
 0xbca   : > { %v1427_v43 = vsel %vm2595_vm9, %v1426_v13, -1e+30 }
 0xbcb   : > { %v1428_v44 = vsel %vm816_vm7, %v1427_v43, -inf }
 0xbcc   : > { %1429 = vmax.xlane.f32.xlu0 %v1428_v44 }
 0xbcf   : > { %v1424_v45 = vpop.f32.mrf.mxu2 }
 0xc3f   : > { %v1430_v20 = vpop.xlane.xlu0 %1429 }
 0xc40   : > { %v1431_v46 = vsub.f32 %v1427_v43, %v1430_v20 }
 0xc42   : > { %v1432_v47 = vmul.f32 1.442695, %v1431_v46 }
 0xc44   : > { %2210 = vpow2.f32 %v1432_v47 }
 0xc4a   : > { %v2211_v48 = vpop.eup %2210 }
 0xc4b   : > { %v1434_v49 = vsel %vm816_vm7, %v2211_v48, 0.0 }
 0xc4c   : > { %1435 = vadd.xlane.f32.xlu0 %v1434_v49 }
 0xc60   : > { %1466 = vrot.lane.b32.xlu0 %v1406_v40, %s3114_s23 }
 0xc68   : > { %1645 = vrot.lane.b32.xlu0 %v1406_v40, %s3115_s27 }
 0xc70   : > { %1643 = vrot.lane.b32.xlu0 %v1405_v29, %s3115_s27 }
 0xcbf   : > { %v1436_v26 = vpop.xlane.xlu0 %1435 }
 0xcc0   : > { %2212 = vrcp.f32 %v1436_v26 }
 0xcc6   : > { %v2213_v53 = vpop.eup %2212 }
 0xcc7   : > { %v1438_v54 = vmul.f32 %v2213_v53, %v2211_v48 }
 0xcc9   : > { %v1439_v55 = vpack.c.bf16 %v1438_v54, %v1438_v54 }
 0xccb   : > { %2073 = vmatmul.msk.bf16.vlgmr.msrb.gmra.mxu3 %vm816_vm7, %v1439_v55 }
 0xcd2   : > { %v1467_v57 = vpop.permute.xlu0 %1466 }
 0xcd3   : > { %v1472_v58 = vsel %vm816_vm7, %v1467_v57, 0 }
 0xcd4   : > { %1481 = vmatpush.bf16.xpose.msrb.mxu0 %v1472_v58 }
 0xcda   : > { %v1646_v61 = vpop.permute.xlu0 %1645 }
 0xcdb   : > { %v1651_v62 = vsel %vm816_vm7, %v1646_v61, 0  ;;  %2074 = vmatmul.msk.bf16.vlgmr.msrb.gmra.mxu0 %vm816_vm7, %v1464_v60  ;;  %v2069_v60 = vld [vmem:[%s3049_s11 + $0x28] sm:$0xff] }
 0xcdc   : > { %1580 = vmatpush.bf16.xpose.msra.mxu0 %v1571_v59  ;;  %1660 = vmatpush.bf16.xpose.msrb.mxu3 %v1651_v62  ;;  %v1524_v61 = vpack.c.bf16 %v2069_v60, %v2069_v60 }
 0xcde   : > { %v1529_v62 = vsel %vm854_vm8, %v1524_v61, 0 }
 0xcdf   : > { %1538 = vmatpush.bf16.msra.mxu2 %v1529_v62 }
 0xce2   : > { %v1644_v18 = vpop.permute.xlu0 %1643 }
 0xceb   : > { %2078 = vmatmul.msk.bf16.vlgmr.msra.gmra.mxu0 %vm816_vm7, %v1564_v63  ;;  %v2070_v63 = vld [vmem:[%s3049_s11 + $0x30] sm:$0xff] }
 0xd4e   : > { %v1456_v3 = vpop.f32.mrf.mxu3 }
 0xd4f   : > { %v1460_v10 = vpack.c.bf16 %v1456_v3, %v1456_v3  ;;  %v1622_v3 = vpack.c.bf16 %v2070_v63, %v2070_v63  ;;  %v2178_v63 = vld [vmem:[%s3051_s13 + $0x1] ss:$0 sm:$0xff] }
 0xd51   : > { %2077 = vmatmul.msk.bf16.vlgmr.msra.gmra.mxu3 %vm816_vm7, %v1460_v10  ;;  %v1627_v10 = vsel %vm854_vm8, %v1622_v3, 0 }
 0xd52   : > { %1636 = vmatpush.bf16.msrb.mxu2 %v1627_v10 }
 0xd56   : > { %v1458_v11 = vpop.f32.mrf.mxu3 }
 0xd58   : > { %v1483_v12 = vpop.f32.mrf.mxu0 }
 0xd59   : > { %v1487_v15 = vmul.f32 0.35355338, %v1483_v12 }
 0xd5b   : > { %v1488_v16 = vsel %vm2595_vm9, %v1487_v15, -1e+30 }
 0xd5c   : > { %v1489_v17 = vsel %vm816_vm7, %v1488_v16, -inf }
 0xd5d   : > { %1490 = vmax.xlane.f32.xlu1 %v1489_v17 }
 0xd60   : > { %v1485_v19 = vpop.f32.mrf.mxu0 }
 0xd61   : > { %2081 = vmatmul.msk.bf16.vlgmr.msrb.gmra.mxu3 %vm816_vm7, %v1644_v18 }
 0xd68   : > { %v1582_v22 = vpop.f32.mrf.mxu0 }
 0xd69   : > { %v1586_v23 = vmul.f32 0.35355338, %v1582_v22 }
 0xd6b   : > { %v1587_v24 = vsel %vm2595_vm9, %v1586_v23, -1e+30 }
 0xd6c   : > { %v1588_v25 = vsel %vm816_vm7, %v1587_v24, -inf }
 0xd6d   : > { %1589 = vmax.xlane.f32.xlu2 %v1588_v25 }
 0xd70   : > { %v1584_v30 = vpop.f32.mrf.mxu0 }
 0xd71   : > { %v2071_v30 = vld [vmem:[%s3049_s11 + $0x38] sm:$0xff] }
 0xd85   : > { %1502 = vrot.lane.b32.xlu2 %v2815_v32, %s3114_s23  ;;  %s1950_s23 = scalar_lea.sflag [#allocation3], %s645_s22 }
 0xdd0   : > { %v1491_v31 = vpop.xlane.xlu1 %1490 }
 0xdd1   : > { %v1492_v33 = vsub.f32 %v1488_v16, %v1491_v31  ;;  %v1702_v31 = vpack.c.bf16 %v2071_v30, %v2071_v30  ;;  %v2105_v30 = vld [vmem:[%s3055_s17 + $0xd8] sm:$0xff] }
 0xdd3   : > { %v1493_v34 = vmul.f32 1.442695, %v1492_v33  ;;  %v1707_v33 = vsel %vm854_vm8, %v1702_v31, 0 }
 0xdd4   : > { %v2851_v36 = vpop.f32.mrf.mxu3 }
 0xdd5   : > { %2214 = vpow2.f32 %v1493_v34 }
 0xddb   : > { %v2215_v37 = vpop.eup %2214 }
 0xddc   : > { %v1561_v38 = vpop.f32.mrf.mxu3  ;;  %v1495_v29 = vsel %vm816_vm7, %v2215_v37, 0.0 }
 0xddd   : > { %1496 = vadd.xlane.f32.xlu1 %v1495_v29 }
 0xde0   : > { %v1590_v40 = vpop.xlane.xlu2 %1589 }
 0xde1   : > { %v1591_v14 = vsub.f32 %v1587_v24, %v1590_v40 }
 0xde3   : > { %v1592_v27 = vmul.f32 1.442695, %v1591_v14 }
 0xde4   : > { %v1662_v41 = vpop.f32.mrf.mxu3 }
 0xde5   : > { %v1666_v42 = vmul.f32 0.35355338, %v1662_v41  ;;  %2216 = vpow2.f32 %v1592_v27 }
 0xde7   : > { %v1667_v21 = vsel %vm2595_vm9, %v1666_v42, -1e+30 }
 0xde8   : > { %v1503_v13 = vpop.permute.xlu2 %1502  ;;  %v1668_v43 = vsel %vm816_vm7, %v1667_v21, -inf }
 0xde9   : > { %v1508_v44 = vsel %vm854_vm8, %v1503_v13, 0  ;;  %1669 = vmax.xlane.f32.xlu0 %v1668_v43  ;;  %v2177_v43 = vld [vmem:[%s3050_s12 + $0x1] ss:$0 sm:$0xff] }
 0xdea   : > { %1517 = vmatpush.bf16.msra.mxu1 %v1508_v44 }
 0xdeb   : > { %v2217_v20 = vpop.eup %2216 }
 0xdec   : > { %v1664_v45 = vpop.f32.mrf.mxu3  ;;  %v1594_v46 = vsel %vm816_vm7, %v2217_v20, 0.0 }
 0xdf1   : > { %1595 = vadd.xlane.f32.xlu0 %v1594_v46 }
 0xdf6   : > { %1600 = vrot.lane.b32.xlu1 %v2815_v32, %s3113_s2  ;;  %s1960_s2 = scalar_lea.hbm %s3118_s5, %s2113_s20  ;;  %s2254_s20 = scalar_lea.hbm %s3118_s5, 16 }
 0xdf7   : > { %s1964_s7 = sshll.u32 %s1960_s2, 4  ;;  %s1965_s7 = int_to_ptr.hbm [resolvable:$true] %s1964_s7 }
 0xe50   : > { %v1497_v47 = vpop.xlane.xlu1 %1496 }
 0xe51   : > { %2218 = vrcp.f32 %v1497_v47 }
 0xe57   : > { %v2219_v48 = vpop.eup %2218 }
 0xe58   : > { %v1499_v35 = vmul.f32 %v2219_v48, %v2215_v37 }
 0xe5a   : > { %v1500_v49 = vpack.c.bf16 %v1499_v35, %v1499_v35 }
 0xe5c   : > { %2075 = vmatmul.msk.bf16.vlgmr.msra.gmra.mxu1 %vm816_vm7, %v1500_v49  ;;  %v1670_v50 = vpop.xlane.xlu0 %1669 }
 0xe5d   : > { %v1671_v51 = vsub.f32 %v1667_v21, %v1670_v50  ;;  %v2090_v50 = vld [vmem:[%s3053_s15 + $0x38] sm:$0xff] }
 0xe5f   : > { %v1672_v52 = vmul.f32 1.442695, %v1671_v51 }
 0xe61   : > { %2220 = vpow2.f32 %v1672_v52  ;;  %v2087_v52 = vld [vmem:[%s3053_s15 + $0x20] sm:$0xff] }
 0xe64   : > { %v1596_v26 = vpop.xlane.xlu0 %1595 }
 0xe65   : > { %2222 = vrcp.f32 %v1596_v26  ;;  %v2088_v26 = vld [vmem:[%s3053_s15 + $0x28] sm:$0xff] }
 0xe67   : > { %v2221_v53 = vpop.eup %2220 }
 0xe68   : > { %v1601_v54 = vpop.permute.xlu1 %1600  ;;  %v1674_v55 = vsel %vm816_vm7, %v2221_v53, 0.0 }
 0xe69   : > { %v1606_v56 = vsel %vm854_vm8, %v1601_v54, 0  ;;  %1675 = vadd.xlane.f32.xlu0 %v1674_v55 }
 0xe6a   : > { %1615 = vmatpush.bf16.msrb.mxu1 %v1606_v56 }
 0xe6b   : > { %v2223_v57 = vpop.eup %2222 }
 0xe6c   : > { %v1598_v58 = vmul.f32 %v2223_v57, %v2217_v20 }
 0xe6e   : > { %v1599_v59 = vpack.c.bf16 %v1598_v58, %v1598_v58  ;;  %1716 = vmatpush.bf16.msra.mxu1 %v1707_v33 }
 0xe70   : > { %2079 = vmatmul.msk.bf16.vlgmr.msrb.gmra.mxu1 %vm816_vm7, %v1599_v59 }
 0xe7d   : > { %1680 = vrot.lane.b32.xlu0 %v2815_v32, %s3115_s27  ;;  %s2248_s27 = sshra.s32 %s1965_s7, 4  ;;  %s2249_s27 = int_to_ptr.hbm [resolvable:$true] %s2248_s27 }
 0xe7e   : > { %p2255_p0 = scmp.lt.s32.totalorder %s2249_s27, %s3118_s5 }
 0xed9   : > { %v1519_v11 = vpop.f32.mrf.mxu1 }
 0xeda   : > { %v1523_v12 = vpack.c.bf16 %v1519_v11, %v1519_v11  ;;  %v2179_v11 = vld [vmem:[%s3052_s14 + $0x1] ss:$0 sm:$0xff] }
 0xedc   : > { %2076 = vmatmul.msk.bf16.vlgmr.msra.gmra.mxu2 %vm816_vm7, %v1523_v12  ;;  %v1676_v15 = vpop.xlane.xlu0 %1675 }
 0xedd   : > { %2224 = vrcp.f32 %v1676_v15 }
 0xee1   : > { %v1521_v32 = vpop.f32.mrf.mxu1 }
 0xee3   : > { %v2225_v16 = vpop.eup %2224 }
 0xee4   : > { %v1678_v18 = vmul.f32 %v2225_v16, %v2221_v53  ;;  %v1770_v53 = vpack.c.bf16 %v2088_v26, %v2087_v52  ;;  %v2108_v16 = vld [vmem:[%s3055_s17 + $0xf0] sm:$0xff] }
 0xee6   : > { %v1679_v24 = vpack.c.bf16 %v1678_v18, %v1678_v18 }
 0xeed   : > { %v1617_v17 = vpop.f32.mrf.mxu1 }
 0xeee   : > { %v1621_v19 = vpack.c.bf16 %v1617_v17, %v1617_v17  ;;  %v2109_v17 = vld [vmem:[%s3055_s17 + $0xf8] sm:$0xff] }
 0xeef   : > { %v1681_v22 = vpop.permute.xlu0 %1680  ;;  %v1862_v18 = vpack.c.bf16 %v2109_v17, %v2108_v16 }
 0xef0   : > { %v1686_v23 = vsel %vm854_vm8, %v1681_v22, 0  ;;  %2080 = vmatmul.msk.bf16.vlgmr.msrb.gmra.mxu2 %vm816_vm7, %v1621_v19  ;;  %v2106_v19 = vld [vmem:[%s3055_s17 + $0xe0] sm:$0xff]  ;;  %v2107_v22 = vld [vmem:[%s3055_s17 + $0xe8] sm:$0xff] }
 0xef1   : > { %1695 = vmatpush.bf16.msrb.mxu0 %v1686_v23  ;;  %1863 = vmatpush.bf16.msra.mxu3 %v1862_v18  ;;  %v1861_v23 = vpack.c.bf16 %v2107_v22, %v2106_v19 }
 0xef4   : > { %2082 = vmatmul.msk.bf16.vlgmr.msrb.gmra.mxu0 %vm816_vm7, %v1679_v24  ;;  %v2180_v24 = vld [vmem:[%s3054_s16 + $0x1] ss:$0 sm:$0xff] }
 0xef5   : > { %v1619_v25 = vpop.f32.mrf.mxu1  ;;  %1864 = vmatpush.bf16.msra.mxu3 %v1861_v23 }
 0xef6   : > { %v2104_v25 = vld [vmem:[%s3055_s17 + $0xd0] sm:$0xff] }
 0xef7   : > { %v1860_v33 = vpack.c.bf16 %v2105_v30, %v2104_v25 }
 0xef9   : > { %1865 = vmatpush.bf16.msra.mxu3 %v1860_v33 }
 0xf5f   : > { %v1540_v34 = vpop.f32.mrf.mxu2 }
 0xf60   : > { %v1560_v29 = vadd.f32 %v2851_v36, %v1540_v34 }
 0xf67   : > { %v1542_v37 = vpop.f32.mrf.mxu2 }
 0xf71   : > { %v1697_v38 = vpop.f32.mrf.mxu0 }
 0xf72   : > { %v1701_v40 = vpack.c.bf16 %v1697_v38, %v1697_v38  ;;  %v2102_v38 = vld [vmem:[%s3055_s17 + $0xc0] sm:$0xff] }
 0xf73   : > { %v1638_v14 = vpop.f32.mrf.mxu2 }
 0xf74   : > { %v1642_v27 = vadd.f32 %v1638_v14, %v1560_v29  ;;  %2083 = vmatmul.msk.bf16.vlgmr.msra.gmra.mxu1 %vm816_vm7, %v1701_v40  ;;  %v2103_v29 = vld [vmem:[%s3055_s17 + $0xc8] sm:$0xff] }
 0xf75   : > { %v1859_v40 = vpack.c.bf16 %v2103_v29, %v2102_v38 }
 0xf77   : > { %1866 = vmatpush.bf16.msra.mxu3 %v1859_v40 }
 0xf79   : > { %v1699_v41 = vpop.f32.mrf.mxu0 }
 0xf7a   : > { %v2100_v41 = vld [vmem:[%s3055_s17 + $0xb0] sm:$0xff] }
 0xf7b   : > { %v1640_v42 = vpop.f32.mrf.mxu2 }
 0xf7c   : > { %v2101_v42 = vld [vmem:[%s3055_s17 + $0xb8] sm:$0xff] }
 0xff1   : > { %v1718_v21 = vpop.f32.mrf.mxu1 }
 0xff2   : > { %v1722_v13 = vadd.f32 %v1718_v21, %v1642_v27 }
 0xff4   : > { %v1723_v44 = vadd.f32 %v1722_v13, %v2753_v39  ;;  %v2089_v39 = vld [vmem:[%s3053_s15 + $0x30] sm:$0xff]  ;;  %v1858_v13 = vpack.c.bf16 %v2101_v42, %v2100_v41 }
 0xff5   : > { %v1771_v51 = vpack.c.bf16 %v2090_v50, %v2089_v39  ;;  %v2096_v50 = vld [vmem:[%s3055_s17 + $0x90] sm:$0xff] }
 0xff6   : > { %v2889_v45 = vadd.f32 %v2177_v43, %v1723_v44  ;;  %1867 = vmatpush.bf16.msra.mxu3 %v1858_v13 }
 0xff7   : > { %1786 = vmatpush.bf16.msra.mxu2 %v1771_v51  ;;  %v2097_v51 = vld [vmem:[%s3055_s17 + $0x98] sm:$0xff] }
 0xff8   : > { %v1734_v36 = vsel %vm699_vm2, %v2889_v45, 0.0  ;;  %v1856_v26 = vpack.c.bf16 %v2097_v51, %v2096_v50  ;;  %v2182_v50 = vld [vmem:[%s3057_s19] ss:$0 sm:$0xff] }
 0xff9   : > { %1735 = vadd.xlane.f32.xlu2 %v1734_v36  ;;  %v1720_v20 = vpop.f32.mrf.mxu1 }
 0xffb   : > { %1787 = vmatpush.bf16.msra.mxu2 %v1770_v53 }
0x106c   : > { %v1736_v46 = vpop.xlane.xlu2 %1735 }
0x106d   : > { %v1737_v47 = vmul.f32 %v1736_v46, %v2527_v28  ;;  %v2098_v46 = vld [vmem:[%s3055_s17 + $0xa0] sm:$0xff] }
0x106f   : > { %v1738_v48 = vsub.f32 %v2889_v45, %v1737_v47  ;;  %v2099_v47 = vld [vmem:[%s3055_s17 + $0xa8] sm:$0xff] }
0x1071   : > { %v1739_v35 = vmul.f32 %v1738_v48, %v1738_v48 }
0x1073   : > { %v1740_v49 = vsel %vm699_vm2, %v1739_v35, 0.0 }
0x1074   : > { %1741 = vadd.xlane.f32.xlu1 %v1740_v49 }
0x10e7   : > { %v1742_v54 = vpop.xlane.xlu1 %1741 }
0x10e8   : > { %v1743_v55 = vmul.f32 %v1742_v54, %v2527_v28 }
0x10ea   : > { %v1744_v56 = vadd.f32 1e-05, %v1743_v55  ;;  %v2094_v55 = vld [vmem:[%s3055_s17 + $0x80] sm:$0xff] }
0x10ec   : > { %2226 = vrsqrt.f32 %v1744_v56  ;;  %vm1751_vm7 = vweird.f32 %v1744_v56 }
0x10f2   : > { %v2227_v57 = vpop.eup %2226 }
0x10f3   : > { %v1746_v58 = vmul.f32 %v2227_v57, %v1744_v56  ;;  %vm1752_vm6 = vweird.f32 %v2227_v57  ;;  %v2095_v56 = vld [vmem:[%s3055_s17 + $0x88] sm:$0xff] }
0x10f4   : > { %vm1753_vm8 = vmor %vm1751_vm7, %vm1752_vm6 }
0x10f5   : > { %v1747_v59 = vmul.f32 %v2227_v57, %v1746_v58  ;;  %v1855_v58 = vpack.c.bf16 %v2095_v56, %v2094_v55 }
0x10f7   : > { %v1748_v60 = vmul.f32 0.5, %v1747_v59 }
0x10f9   : > { %v1749_v61 = vsub.f32 1.5, %v1748_v60 }
0x10fb   : > { %v1750_v62 = vmul.f32 %v2227_v57, %v1749_v61 }
0x10fd   : > { %v1754_v3 = vsel %vm1753_vm8, %v2227_v57, %v1750_v62 }
0x10fe   : > { %v1755_v10 = vmul.f32 %v1754_v3, %v1738_v48  ;;  %v1857_v48 = vpack.c.bf16 %v2099_v47, %v2098_v46 }
0x1100   : > { %v1759_v12 = vmul.f32 %v2178_v63, %v1755_v10  ;;  %1868 = vmatpush.bf16.msra.mxu3 %v1857_v48 }
0x1102   : > { %v1763_v32 = vadd.f32 %v2179_v11, %v1759_v12 }
0x1104   : > { %v1769_v15 = vpack.c.bf16 %v1763_v32, %v1763_v32  ;;  %1869 = vmatpush.bf16.msra.mxu3 %v1856_v26 }
0x1106   : > { %2092 = vmatmul.msk.bf16.vlgmr.msra.gmra.mxu2 %vm699_vm2, %v1769_v15 }
0x1108   : > { %1870 = vmatpush.bf16.msra.mxu3 %v1855_v58 }
0x1189   : > { %v1789_v31 = vpop.f32.mrf.mxu2 }
0x118a   : > { %v2937_v34 = vadd.f32 %v2180_v24, %v1789_v31 }
0x118c   : > { %v1794_v37 = vmul.f32 0.70710677, %v2937_v34  ;;  %v1793_v38 = vmul.f32 0.5, %v2937_v34  ;;  %v1933_v34 = vsel %vm699_vm2, %v1919_v4, 0  ;;  %v2233_v4 = vld [vmem:[%s3100_s24] sm:$0xff] }
0x118d   : > { %1939 = vmatpush.bf16.xpose.msra.mxu0 %v1933_v34  ;;  %v1916_v47 = vpack.c.bf16 %v2232_v1, %v2233_v4 }
0x118e   : > { %v1795_v14 = vmul.f32 %v1794_v37, %v1794_v37 }
0x118f   : > { %v1924_v2 = vsel %vm699_vm2, %v1916_v47, 0 }
0x1190   : > { %v1796_v27 = vmin.f32 %v1795_v14, 16.0 }
0x1191   : > { %v1791_v21 = vpop.f32.mrf.mxu2 }
0x1192   : > { %v1797_v43 = vmul.f32 2.1237322e-06, %v1796_v27  ;;  %v1808_v44 = vmul.f32 3.8918573e-05, %v1796_v27 }
0x1194   : > { %v1798_v36 = vadd.f32 0.00028619796, %v1797_v43  ;;  %v1809_v20 = vadd.f32 0.001143296, %v1808_v44 }
0x1196   : > { %v1799_v35 = vmul.f32 %v1798_v36, %v1796_v27  ;;  %v1810_v49 = vmul.f32 %v1809_v20, %v1796_v27 }
0x1198   : > { %v1811_v39 = vadd.f32 0.014752088, %v1810_v49  ;;  %v1800_v52 = vadd.f32 0.0036580483, %v1799_v35 }
0x119a   : > { %v1812_v53 = vmul.f32 %v1811_v39, %v1796_v27  ;;  %v1801_v57 = vmul.f32 %v1800_v52, %v1796_v27 }
0x119c   : > { %v1813_v54 = vadd.f32 0.112945676, %v1812_v53  ;;  %v1802_v61 = vadd.f32 0.05243302, %v1801_v57 }
0x119e   : > { %v1814_v59 = vmul.f32 %v1813_v54, %v1796_v27  ;;  %v1803_v3 = vmul.f32 %v1802_v61, %v1796_v27 }
0x11a0   : > { %v1815_v60 = vadd.f32 0.4994258, %v1814_v59  ;;  %v1804_v10 = vadd.f32 0.18741608, %v1803_v3 }
0x11a2   : > { %v1816_v62 = vmul.f32 %v1815_v60, %v1796_v27  ;;  %v1805_v12 = vmul.f32 %v1804_v10, %v1796_v27  ;;  %v2181_v27 = vld [vmem:[%s3056_s18 + $0x1] ss:$0 sm:$0xff] }
0x11a4   : > { %v1817_v63 = vadd.f32 1.0, %v1816_v62  ;;  %v1806_v17 = vadd.f32 1.1283791, %v1805_v12 }
0x11a6   : > { %2228 = vrcp.f32 %v1817_v63  ;;  %v1829_v16 = vand.u32 2147483648, %v1817_v63  ;;  %v1827_v19 = vand.u32 2147483647, %v1817_v63  ;;  %vm1823_vm10 = vweird.f32 %v1817_v63 }
0x11a7   : > { %v1807_v24 = vmul.f32 %v1806_v17, %v1794_v37 }
0x11a8   : > { %v1830_v23 = vor.u32 1.1754944e-38, %v1829_v16  ;;  %vm1828_vm12 = vcmp.eq.f32.partialorder %v1827_v19, 8.507059e+37 }
0x11ac   : > { %v2229_v11 = vpop.eup %2228 }
0x11ad   : > { %v1819_v32 = vmul.f32 %v2229_v11, %v1817_v63  ;;  %vm1824_vm9 = vweird.f32 %v2229_v11 }
0x11ae   : > { %vm1825_vm11 = vmor %vm1823_vm10, %vm1824_vm9 }
0x11af   : > { %v1820_v15 = vsub.f32 1.0, %v1819_v32 }
0x11b1   : > { %v1821_v18 = vmul.f32 %v2229_v11, %v1820_v15 }
0x11b3   : > { %v1822_v22 = vadd.f32 %v2229_v11, %v1821_v18 }
0x11b5   : > { %v1826_v25 = vsel %vm1825_vm11, %v2229_v11, %v1822_v22 }
0x11b6   : > { %v1831_v30 = vsel %vm1828_vm12, %v1830_v23, %v1826_v25 }
0x11b7   : > { %v1832_v31 = vmul.f32 %v1831_v30, %v1807_v24 }
0x11b9   : > { %v2093_v33 = vclamps-f32 %v1832_v31, 1.0 }
0x11bb   : > { %v1835_v29 = vadd.f32 1.0, %v2093_v33 }
0x11bd   : > { %v1836_v40 = vmul.f32 %v1835_v29, %v1793_v38 }
0x11bf   : > { %v1854_v14 = vpack.c.bf16 %v1836_v40, %v1836_v40 }
0x11c1   : > { %1871 = vmatmul.bf16.vlgmr.msra.gmra.mxu3 %v1854_v14 }
0x1244   : > { %v1872_v41 = vpop.f32.mrf.mxu3 }
0x1245   : > { %v1876_v42 = vadd.f32 %v1872_v41, %v2889_v45  ;;  %v1930_v45 = vsel %vm699_vm2, %v1918_v8, 0 }
0x1246   : > { %1940 = vmatpush.bf16.xpose.msra.mxu0 %v1930_v45 }
0x1247   : > { %v1882_v21 = vadd.f32 %v2181_v27, %v1876_v42 }
0x1249   : > { %v1885_v37 = vsel %vm699_vm2, %v1882_v21, 0.0 }
0x124a   : > { %1886 = vadd.xlane.f32.xlu0 %v1885_v37 }
0x124c   : > { %v1874_v13 = vpop.f32.mrf.mxu3 }
0x124e   : > { %1941 = vmatpush.bf16.xpose.msra.mxu0 %v1927_v0 }
0x1256   : > { %1942 = vmatpush.bf16.xpose.msra.mxu0 %v1924_v2 }
0x12bd   : > { %v1887_v43 = vpop.xlane.xlu0 %1886 }
0x12be   : > { %v1888_v44 = vmul.f32 %v1887_v43, %v2527_v28 }
0x12c0   : > { %v1889_v36 = vsub.f32 %v1882_v21, %v1888_v44 }
0x12c2   : > { %v1890_v20 = vmul.f32 %v1889_v36, %v1889_v36 }
0x12c4   : > { %v1891_v46 = vsel %vm699_vm2, %v1890_v20, 0.0 }
0x12c5   : > { %1892 = vadd.xlane.f32.xlu2 %v1891_v46 }
0x1338   : > { %v1893_v5 = vpop.xlane.xlu2 %1892 }
0x1339   : > { %v1894_v8 = vmul.f32 %v1893_v5, %v2527_v28  ;;  %v2183_v28 = vld [vmem:[%s3116_s1] ss:$0 sm:$0xff]  ;;  %s2250_s1 = scalar_lea.hbm %s2249_s27, 8 }
0x133a   : > { %p2251_p11 = scmp.ne.s32.totalorder %s2249_s27, %s2250_s1  ;;  %p2256_p1 = scmp.lt.s32.totalorder %s2254_s20, %s2250_s1 }
0x133b   : > { %v1895_v48 = vadd.f32 1e-05, %v1894_v8 }
0x133c   : > { %p2252_p12 = pnand %p2251_p11, %p2452_p5  ;;  %p2257_p2 = por %p2256_p1, %p2255_p0 }
0x133d   : > { %2230 = vrsqrt.f32 %v1895_v48  ;;  %vm1902_vm14 = vweird.f32 %v1895_v48 }
0x133e   : > { %p2253_p13 = pneg %p2252_p12 }
0x1340   : > { %p2258_p3 = pnand %p2257_p2, %p2253_p13 }
0x1343   : > { %v2231_v6 = vpop.eup %2230 }
0x1344   : > { %v1897_v7 = vmul.f32 %v2231_v6, %v1895_v48  ;;  %vm1903_vm13 = vweird.f32 %v2231_v6 }
0x1345   : > { %vm1904_vm15 = vmor %vm1902_vm14, %vm1903_vm13 }
0x1346   : > { %v1898_v9 = vmul.f32 %v2231_v6, %v1897_v7 }
0x1348   : > { %v1899_v35 = vmul.f32 0.5, %v1898_v9 }
0x134a   : > { %v1900_v49 = vsub.f32 1.5, %v1899_v35 }
0x134c   : > { %v1901_v39 = vmul.f32 %v2231_v6, %v1900_v49 }
0x134e   : > { %v1905_v51 = vsel %vm1904_vm15, %v2231_v6, %v1901_v39 }
0x134f   : > { %v1906_v52 = vmul.f32 %v1905_v51, %v1889_v36 }
0x1351   : > { %v1910_v26 = vmul.f32 %v2182_v50, %v1906_v52 }
0x1353   : > { %v1914_v53 = vadd.f32 %v2183_v28, %v1910_v26 }
0x1355   : > { %v1915_v54 = vpack.c.bf16 %v1914_v53, %v1914_v53 }
0x1357   : > { %2111 = vmatmul.msk.bf16.vlgmr.msra.gmra.mxu0 %vm699_vm2, %v1915_v54 }
0x13d4   : > { %v1944_v55 = vpop.f32.mrf.mxu0 }
0x13d5   : > { %1948 = vst.msk [vmem:[%s647_s0] sm:$0xff] %vm670_vm0, %v1944_v55 }
0x13d6   : > { %2261 = shalt.err (!%p2258_p3)
}
0x13d7   : > { %2116 = dma.vmem_to_hbm [thread:$0]  (%p2452_p5), %s1963_s6, 128, %s1965_s7, %s1950_s23  }
0x13dc   : > { %v1946_v56 = vpop.f32.mrf.mxu0 }
0x13dd PF: > { %s3119_s0 = sld [smem:[#allocation7_spill]] }
0x13de   : > { %s3120_s22 = sld [smem:[#allocation5_spill]] }
0x13e3   : > { %p2122_p4 = scmp.ge.s32.totalorder %s3119_s0, 2 }
0x13e4   : > { %s1976_s2 = sand.u32 1, %s3120_s22  }
0x13e5   : > { %p2119_p7 = pnand %p2122_p4, %p2456_p6  ;;  %s1977_s8 = scalar_lea.sflag [#allocation3], %s1976_s2 }
0x13e7   : > { %p2120_p8 = pneg %p2119_p7 }
0x13e9   : > { %2279 = dma.done.wait (%p2120_p8), %s1977_s8, 128  }
0x13ea   : > { %2281 = vsyncadd (%p2120_p8), %s1977_s8, 4294967168  ;;  %s3122_s27 = sld [smem:[#allocation8_spill]]  ;;  %s3125_s2 = smov %s2288_s25 }
0x13eb   : > { %s3123_s1 = sld [smem:[#allocation6_spill]] }
0x13ec   : > { %s3124_s26 = sld [smem:[#allocation9_spill]] }
0x13f0   : > { %p31_p9 = scmp.ge.s32.totalorder %s3122_s27, 4  }
0x13f1   : > { %s3126_s25 = smov %s3123_s1 }
0x13f2   :  { %33 = sbr.rel (!%p31_p9) target bundleno = 15 (0xf), region = 155 }
0x13f7   :  { %1983 = vsyncpa [#allocation3], 1 }
0x13f8   :  { %1985 = vsyncpa [#allocation3 + $0x1], 1 }

</bundles_post_ra>
